<compile_context>
chip_gen: v7x
topology: tpu7x:2x2x1
jax: 0.10.0
libtpu: 0.0.40
codegen_flags: <defaults>
</compile_context>

<pallas_src>
import functools

import jax
import jax.numpy as jnp
from jax.experimental import pallas as pl
from jax.experimental.pallas import tpu as pltpu  # noqa: F401  (TPU backend)


# ----------------------------------------------------------------------------
# Fused Pallas kernel: all encoder layers + aggregation + projection
# ----------------------------------------------------------------------------
def revdict_fused_kernel(x_ref, add_mask_ref, keep_ref,
                         wqkv_ref, bqkv_ref, wo_ref,
                         w1_ref, b1_ref, w2_ref,
                         vecs_ref, we_ref, be_ref,
                         out_ref, *, n_head):
    """Fused RevdictBase forward for the whole batch (single program, no grid).

    x_ref       : (B, S, D)   f32   embeddings + positional encoding
    add_mask_ref: (B, 1, S)   f32   additive key-padding mask (0 / -1e9)
    keep_ref    : (B, S, 1)   f32   1.0 for real tokens, 0.0 for padding
    wqkv_ref    : (L, D, 3D)  bf16  [Wq | Wk | Wv] per layer (fused QKV)
    bqkv_ref    : (L, 1, 3D)  f32
    wo_ref      : (L, D, D)   bf16  attention output projection
    w1_ref      : (L, D, F)   bf16  FFN up        (F = 2D)
    b1_ref      : (L, 1, F)   f32
    w2_ref      : (L, F, D)   bf16  FFN down
    vecs_ref    : (L, 6, D)   f32   rows: bo, b2, ln1w, ln1b, ln2w, ln2b
    we_ref      : (D, d_out)  bf16  e_proj weight
    be_ref      : (1, d_out)  f32   e_proj bias
    out_ref     : (B, d_out)  f32
    """
    B, S, D = x_ref.shape
    BS = B * S
    L = wqkv_ref.shape[0]
    dh = D // n_head
    scale = 1.0 / (dh ** 0.5)
    eps = 1e-5

    add_mask = add_mask_ref[...]                      # (B, 1, S) f32
    x = x_ref[...].reshape(BS, D)                     # (B*S, D)  f32, stays resident

    def layer_norm(v, w, b):                          # f32 VPU/EUP math
        mu = jnp.mean(v, axis=-1, keepdims=True)
        var = jnp.mean(jnp.square(v - mu), axis=-1, keepdims=True)
        return (v - mu) * jax.lax.rsqrt(var + eps) * w + b

    for li in range(L):                               # static unroll (L is small)
        vecs = vecs_ref[li]                           # (6, D) f32
        bo, b2 = vecs[0:1], vecs[1:2]
        ln1w, ln1b = vecs[2:3], vecs[3:4]
        ln2w, ln2b = vecs[4:5], vecs[5:6]
        wo_l = wo_ref[li]                             # (D, D) bf16

        # ---- fused QKV projection: one (BS, D) x (D, 3D) bf16 MXU matmul ----
        qkv = jnp.dot(x.astype(jnp.bfloat16), wqkv_ref[li],
                      preferred_element_type=jnp.float32) + bqkv_ref[li]   # (BS, 3D) f32
        qkv3 = qkv.reshape(B, S, 3 * D)

        # ---- per-head attention, output projection accumulated over heads ----
        attn = jnp.zeros((BS, D), jnp.float32)
        for h in range(n_head):
            lo = h * dh
            qh = qkv3[:, :, lo:lo + dh]                               # (B, S, dh)
            kh = qkv3[:, :, D + lo:D + lo + dh]
            vh = qkv3[:, :, 2 * D + lo:2 * D + lo + dh]

            s = jnp.einsum('bqd,bkd->bqk',
                           qh.astype(jnp.bfloat16), kh.astype(jnp.bfloat16),
                           preferred_element_type=jnp.float32) * scale + add_mask
            s = s - jnp.max(s, axis=-1, keepdims=True)                # f32 softmax
            p = jnp.exp(s)
            p = p * pl.reciprocal(jnp.sum(p, axis=-1, keepdims=True), approx=True)

            oh = jnp.einsum('bqk,bkd->bqd',
                            p.astype(jnp.bfloat16), vh.astype(jnp.bfloat16),
                            preferred_element_type=jnp.float32)       # (B, S, dh)
            # concat-of-heads @ Wo  ==  sum_h  o_h @ Wo[h*dh:(h+1)*dh, :]
            attn = attn + jnp.dot(oh.reshape(BS, dh).astype(jnp.bfloat16),
                                  wo_l[lo:lo + dh, :],
                                  preferred_element_type=jnp.float32)
        attn = attn + bo

        # ---- residual + LayerNorm 1 (post-LN) ----
        y = layer_norm(x + attn, ln1w, ln1b)

        # ---- feed forward (ReLU), bf16 MXU matmuls, f32 accumulate ----
        h1 = jnp.maximum(
            jnp.dot(y.astype(jnp.bfloat16), w1_ref[li],
                    preferred_element_type=jnp.float32) + b1_ref[li], 0.0)
        ffn = jnp.dot(h1.astype(jnp.bfloat16), w2_ref[li],
                      preferred_element_type=jnp.float32) + b2

        # ---- residual + LayerNorm 2 ----
        x = layer_norm(y + ffn, ln2w, ln2b)

    # ---- aggout='avg': masked mean over seq, ReLU, e_proj ----
    keep = keep_ref[...]                               # (B, S, 1)
    x3 = x.reshape(B, S, D)
    summed = jnp.sum(x3 * keep, axis=1)                # (B, D)
    cnt = jnp.maximum(jnp.sum(keep, axis=1), 1.0)      # (B, 1) guard vs all-pad row
    mean = summed * pl.reciprocal(cnt, approx=True)
    act = jnp.maximum(mean, 0.0)
    out_ref[...] = jnp.dot(act.astype(jnp.bfloat16), we_ref[...],
                           preferred_element_type=jnp.float32) + be_ref[...]


# ----------------------------------------------------------------------------
# Forward pass (aggout='avg', multitask_size=None, inference: dropout = identity)
# ----------------------------------------------------------------------------
def revdict_forward(gloss_tensor, params, padding_idx, n_head):
    """gloss_tensor: (S, B) int32, seq-first as in the PyTorch module."""
    tokens = gloss_tensor.T                                  # (B, S)
    B, S = tokens.shape
    d_out = params["be"].shape[-1]

    # Embedding gather + positional encoding: plain-JAX glue around the kernel.
    embs = jnp.take(params["embedding"], tokens, axis=0)     # (B, S, D)
    x = (embs + params["pe"][None, :S, :]).astype(jnp.float32)

    is_pad = tokens == padding_idx
    add_mask = jnp.where(is_pad, -1e9, 0.0).astype(jnp.float32)[:, None, :]   # (B, 1, S)
    keep = (~is_pad).astype(jnp.float32)[:, :, None]                          # (B, S, 1)

    # TODO(synk): dropout layers are treated as identity (inference mode).
    kernel = functools.partial(revdict_fused_kernel, n_head=n_head)
    return pl.pallas_call(
        kernel,
        out_shape=jax.ShapeDtypeStruct((B, d_out), jnp.float32),
        # No grid: the whole (tiny) problem is a single program; every operand
        # is a whole-array VMEM block and activations never round-trip HBM
        # between layers.  (At B=2 a single TensorCore is right even on v7x.)
    )(x, add_mask, keep,
      params["wqkv"], params["bqkv"], params["wo"],
      params["w1"], params["b1"], params["w2"],
      params["vecs"], params["we"], params["be"])


# ----------------------------------------------------------------------------
# Parameters (deterministic synthetic init mirroring module shapes)
# ----------------------------------------------------------------------------
def _sinusoidal_pe(maxlen, d_emb):
    pos = jnp.arange(maxlen, dtype=jnp.float32)[:, None]
    div = jnp.exp(jnp.arange(0, d_emb, 2, dtype=jnp.float32) * (-jnp.log(10000.0) / d_emb))
    pe = jnp.zeros((maxlen, d_emb), jnp.float32)
    pe = pe.at[:, 0::2].set(jnp.sin(pos * div))
    pe = pe.at[:, 1::2].set(jnp.cos(pos * div))
    return pe


def _xavier(key, shape):
    fan_in, fan_out = shape[-2], shape[-1]
    limit = (6.0 / (fan_in + fan_out)) ** 0.5
    return jax.random.uniform(key, shape, jnp.float32, -limit, limit)


def init_params(key, max_vocab_idx, d_emb, d_output, n_head, n_layers, maxlen, padding_idx):
    d_ff = 2 * d_emb
    keys = jax.random.split(key, 2 + n_layers)

    emb = _xavier(keys[0], (max_vocab_idx, d_emb))
    emb = emb.at[padding_idx].set(0.0)       # nn.Embedding(padding_idx=...) zeroes the pad row

    wqkv, bqkv, wo, w1, b1, w2, vecs = [], [], [], [], [], [], []
    for li in range(n_layers):
        lk = jax.random.split(keys[2 + li], 6)
        wq = _xavier(lk[0], (d_emb, d_emb))
        wk = _xavier(lk[1], (d_emb, d_emb))
        wv = _xavier(lk[2], (d_emb, d_emb))
        wqkv.append(jnp.concatenate([wq, wk, wv], axis=1))           # (D, 3D)
        bqkv.append(jnp.zeros((1, 3 * d_emb), jnp.float32))
        wo.append(_xavier(lk[3], (d_emb, d_emb)))                    # (D, D)
        w1.append(_xavier(lk[4], (d_emb, d_ff)))
        b1.append(jnp.zeros((1, d_ff), jnp.float32))
        w2.append(_xavier(lk[5], (d_ff, d_emb)))
        vecs.append(jnp.stack([jnp.zeros((d_emb,), jnp.float32),     # bo
                               jnp.zeros((d_emb,), jnp.float32),     # b2
                               jnp.ones((d_emb,), jnp.float32),      # ln1 weight
                               jnp.zeros((d_emb,), jnp.float32),     # ln1 bias
                               jnp.ones((d_emb,), jnp.float32),      # ln2 weight
                               jnp.zeros((d_emb,), jnp.float32)]))   # ln2 bias

    return {
        "embedding": emb,
        "pe": _sinusoidal_pe(maxlen, d_emb),
        # Large matmul weights are fed to the MXU as bfloat16 (f32 accumulation).
        "wqkv": jnp.stack(wqkv).astype(jnp.bfloat16),    # (L, D, 3D)
        "bqkv": jnp.stack(bqkv),                         # (L, 1, 3D) f32
        "wo":   jnp.stack(wo).astype(jnp.bfloat16),      # (L, D, D)
        "w1":   jnp.stack(w1).astype(jnp.bfloat16),      # (L, D, 2D)
        "b1":   jnp.stack(b1),                           # (L, 1, 2D) f32
        "w2":   jnp.stack(w2).astype(jnp.bfloat16),      # (L, 2D, D)
        "vecs": jnp.stack(vecs),                         # (L, 6, D)  f32
        "we":   _xavier(keys[1], (d_emb, d_output)).astype(jnp.bfloat16),
        "be":   jnp.zeros((1, d_output), jnp.float32),
    }


# ----------------------------------------------------------------------------
if __name__ == "__main__":
    PAD_ix, EOS_ix = 0, 2
    SEQ, BATCH = 8, 2
    MAX_VOCAB = 50
    D_EMB, D_OUT, N_HEAD, N_LAYERS, MAXLEN = 32, 32, 4, 2, 16

    key = jax.random.PRNGKey(0)
    pkey, dkey = jax.random.split(key)

    params = init_params(pkey, MAX_VOCAB, D_EMB, D_OUT, N_HEAD, N_LAYERS, MAXLEN, PAD_ix)

    # deterministic synthetic gloss batch (seq-first), with EOS and some padding
    gloss = jax.random.randint(dkey, (SEQ, BATCH), 3, MAX_VOCAB, dtype=jnp.int32)
    gloss = gloss.at[SEQ - 1, :].set(EOS_ix)
    gloss = gloss.at[SEQ - 3:, 1].set(PAD_ix)   # second sequence is shorter (padded)

    out = revdict_forward(gloss, params, PAD_ix, N_HEAD)
    out = jax.block_until_ready(out)

    assert out.shape == (BATCH, D_OUT), out.shape
    assert bool(jnp.all(jnp.isfinite(out)))
    print("KERNEL_OK")
</pallas_src>

<mosaic_0001>
module attributes {stable_mosaic.version = 11 : i64} {
  func.func @revdict_fused_kernel(%arg0: memref<2x8x32xf32, #tpu.memory_space<vmem>>, %arg1: memref<2x1x8xf32, #tpu.memory_space<vmem>>, %arg2: memref<2x8x1xf32, #tpu.memory_space<vmem>>, %arg3: memref<2x32x96xbf16, #tpu.memory_space<vmem>>, %arg4: memref<2x1x96xf32, #tpu.memory_space<vmem>>, %arg5: memref<2x32x32xbf16, #tpu.memory_space<vmem>>, %arg6: memref<2x32x64xbf16, #tpu.memory_space<vmem>>, %arg7: memref<2x1x64xf32, #tpu.memory_space<vmem>>, %arg8: memref<2x64x32xbf16, #tpu.memory_space<vmem>>, %arg9: memref<2x6x32xf32, #tpu.memory_space<vmem>>, %arg10: memref<32x32xbf16, #tpu.memory_space<vmem>>, %arg11: memref<1x32xf32, #tpu.memory_space<vmem>>, %arg12: memref<2x32xf32, #tpu.memory_space<vmem>>) attributes {dimension_semantics = [], scalar_prefetch = 0 : i64, scratch_operands = 0 : i64, tpu.core_type = #tpu.core_type<tc>} {
    %c0 = arith.constant 0 : index
    %c0_0 = arith.constant 0 : index
    %c0_1 = arith.constant 0 : index
    %0 = vector.load %arg1[%c0, %c0_0, %c0_1] : memref<2x1x8xf32, #tpu.memory_space<vmem>>, vector<2x1x8xf32>
    %c0_2 = arith.constant 0 : index
    %c0_3 = arith.constant 0 : index
    %c0_4 = arith.constant 0 : index
    %1 = vector.load %arg0[%c0_2, %c0_3, %c0_4] : memref<2x8x32xf32, #tpu.memory_space<vmem>>, vector<2x8x32xf32>
    %2 = vector.shape_cast %1 : vector<2x8x32xf32> to vector<16x32xf32>
    %c0_5 = arith.constant 0 : index
    %c0_6 = arith.constant 0 : index
    %c0_7 = arith.constant 0 : index
    %3 = vector.load %arg9[%c0_5, %c0_6, %c0_7] : memref<2x6x32xf32, #tpu.memory_space<vmem>>, vector<1x6x32xf32>
    %4 = vector.shape_cast %3 : vector<1x6x32xf32> to vector<6x32xf32>
    %5 = vector.extract_strided_slice %4 {offsets = [0, 0], sizes = [1, 32], strides = [1, 1]} : vector<6x32xf32> to vector<1x32xf32>
    %6 = vector.extract_strided_slice %4 {offsets = [1, 0], sizes = [1, 32], strides = [1, 1]} : vector<6x32xf32> to vector<1x32xf32>
    %7 = vector.extract_strided_slice %4 {offsets = [2, 0], sizes = [1, 32], strides = [1, 1]} : vector<6x32xf32> to vector<1x32xf32>
    %8 = vector.extract_strided_slice %4 {offsets = [3, 0], sizes = [1, 32], strides = [1, 1]} : vector<6x32xf32> to vector<1x32xf32>
    %9 = vector.extract_strided_slice %4 {offsets = [4, 0], sizes = [1, 32], strides = [1, 1]} : vector<6x32xf32> to vector<1x32xf32>
    %10 = vector.extract_strided_slice %4 {offsets = [5, 0], sizes = [1, 32], strides = [1, 1]} : vector<6x32xf32> to vector<1x32xf32>
    %c0_8 = arith.constant 0 : index
    %c0_9 = arith.constant 0 : index
    %c0_10 = arith.constant 0 : index
    %11 = vector.load %arg5[%c0_8, %c0_9, %c0_10] : memref<2x32x32xbf16, #tpu.memory_space<vmem>>, vector<1x32x32xbf16>
    %12 = vector.shape_cast %11 : vector<1x32x32xbf16> to vector<32x32xbf16>
    %13 = arith.truncf %2 : vector<16x32xf32> to vector<16x32xbf16>
    %c0_11 = arith.constant 0 : index
    %c0_12 = arith.constant 0 : index
    %c0_13 = arith.constant 0 : index
    %14 = vector.load %arg3[%c0_11, %c0_12, %c0_13] : memref<2x32x96xbf16, #tpu.memory_space<vmem>>, vector<1x32x96xbf16>
    %15 = vector.shape_cast %14 : vector<1x32x96xbf16> to vector<32x96xbf16>
    %cst = arith.constant dense<0.000000e+00> : vector<16x96xf32>
    %16 = tpu.matmul %13, %15, %cst {dimension_numbers = #tpu.dot_dimension_numbers<[1], [0], [0], [1], [0, 0, 1, 1], [], []>} : vector<16x32xbf16>, vector<32x96xbf16>, vector<16x96xf32> -> vector<16x96xf32>
    %c0_14 = arith.constant 0 : index
    %c0_15 = arith.constant 0 : index
    %c0_16 = arith.constant 0 : index
    %17 = vector.load %arg4[%c0_14, %c0_15, %c0_16] : memref<2x1x96xf32, #tpu.memory_space<vmem>>, vector<1x1x96xf32>
    %18 = vector.shape_cast %17 : vector<1x1x96xf32> to vector<1x96xf32>
    %19 = vector.broadcast %18 : vector<1x96xf32> to vector<16x96xf32>
    %20 = arith.addf %16, %19 : vector<16x96xf32>
    %21 = vector.shape_cast %20 : vector<16x96xf32> to vector<2x8x96xf32>
    %cst_17 = arith.constant 0.000000e+00 : f32
    %22 = vector.broadcast %cst_17 : f32 to vector<16x32xf32>
    %23 = vector.extract_strided_slice %21 {offsets = [0, 0, 0], sizes = [2, 8, 8], strides = [1, 1, 1]} : vector<2x8x96xf32> to vector<2x8x8xf32>
    %24 = vector.extract_strided_slice %21 {offsets = [0, 0, 32], sizes = [2, 8, 8], strides = [1, 1, 1]} : vector<2x8x96xf32> to vector<2x8x8xf32>
    %25 = vector.extract_strided_slice %21 {offsets = [0, 0, 64], sizes = [2, 8, 8], strides = [1, 1, 1]} : vector<2x8x96xf32> to vector<2x8x8xf32>
    %26 = arith.truncf %23 : vector<2x8x8xf32> to vector<2x8x8xbf16>
    %27 = arith.truncf %24 : vector<2x8x8xf32> to vector<2x8x8xbf16>
    "tpu.trace_start"() <{level = 10 : i32, message = "bqd,bkd->bqk"}> : () -> ()
    %cst_18 = arith.constant dense<0.000000e+00> : vector<2x8x8xf32>
    %28 = tpu.matmul %26, %27, %cst_18 {dimension_numbers = #tpu.dot_dimension_numbers<[2], [2], [1], [1], [0, 0, 0, 1, 1, 1], [0], [0]>} : vector<2x8x8xbf16>, vector<2x8x8xbf16>, vector<2x8x8xf32> -> vector<2x8x8xf32>
    "tpu.trace_stop"() : () -> ()
    %cst_19 = arith.constant 0.353553385 : f32
    %29 = vector.broadcast %cst_19 : f32 to vector<2x8x8xf32>
    %30 = arith.mulf %28, %29 : vector<2x8x8xf32>
    %31 = vector.broadcast %0 : vector<2x1x8xf32> to vector<2x8x8xf32>
    %32 = arith.addf %30, %31 : vector<2x8x8xf32>
    %cst_20 = arith.constant dense<0xFF800000> : vector<2x8xf32>
    %33 = vector.multi_reduction <maximumf>, %32, %cst_20 [2] : vector<2x8x8xf32> to vector<2x8xf32>
    %34 = vector.shape_cast %33 : vector<2x8xf32> to vector<2x8x1xf32>
    %35 = vector.broadcast %34 : vector<2x8x1xf32> to vector<2x8x8xf32>
    %36 = arith.subf %32, %35 : vector<2x8x8xf32>
    %37 = math.exp %36 : vector<2x8x8xf32>
    %cst_21 = arith.constant dense<0.000000e+00> : vector<2x8xf32>
    %38 = vector.multi_reduction <add>, %37, %cst_21 [2] : vector<2x8x8xf32> to vector<2x8xf32>
    %39 = vector.shape_cast %38 : vector<2x8xf32> to vector<2x8x1xf32>
    %40 = tpu.reciprocal %39 {approx = true} : vector<2x8x1xf32> -> vector<2x8x1xf32>
    %41 = vector.broadcast %40 : vector<2x8x1xf32> to vector<2x8x8xf32>
    %42 = arith.mulf %37, %41 : vector<2x8x8xf32>
    %43 = arith.truncf %42 : vector<2x8x8xf32> to vector<2x8x8xbf16>
    %44 = arith.truncf %25 : vector<2x8x8xf32> to vector<2x8x8xbf16>
    "tpu.trace_start"() <{level = 10 : i32, message = "bqk,bkd->bqd"}> : () -> ()
    %cst_22 = arith.constant dense<0.000000e+00> : vector<2x8x8xf32>
    %45 = tpu.matmul %43, %44, %cst_22 {dimension_numbers = #tpu.dot_dimension_numbers<[2], [1], [1], [2], [0, 0, 0, 1, 1, 2], [0], [0]>} : vector<2x8x8xbf16>, vector<2x8x8xbf16>, vector<2x8x8xf32> -> vector<2x8x8xf32>
    "tpu.trace_stop"() : () -> ()
    %46 = vector.shape_cast %45 : vector<2x8x8xf32> to vector<16x8xf32>
    %47 = arith.truncf %46 : vector<16x8xf32> to vector<16x8xbf16>
    %48 = vector.extract_strided_slice %12 {offsets = [0, 0], sizes = [8, 32], strides = [1, 1]} : vector<32x32xbf16> to vector<8x32xbf16>
    %cst_23 = arith.constant dense<0.000000e+00> : vector<16x32xf32>
    %49 = tpu.matmul %47, %48, %cst_23 {dimension_numbers = #tpu.dot_dimension_numbers<[1], [0], [0], [1], [0, 0, 1, 1], [], []>} : vector<16x8xbf16>, vector<8x32xbf16>, vector<16x32xf32> -> vector<16x32xf32>
    %50 = arith.addf %22, %49 : vector<16x32xf32>
    %51 = vector.extract_strided_slice %21 {offsets = [0, 0, 8], sizes = [2, 8, 8], strides = [1, 1, 1]} : vector<2x8x96xf32> to vector<2x8x8xf32>
    %52 = vector.extract_strided_slice %21 {offsets = [0, 0, 40], sizes = [2, 8, 8], strides = [1, 1, 1]} : vector<2x8x96xf32> to vector<2x8x8xf32>
    %53 = vector.extract_strided_slice %21 {offsets = [0, 0, 72], sizes = [2, 8, 8], strides = [1, 1, 1]} : vector<2x8x96xf32> to vector<2x8x8xf32>
    %54 = arith.truncf %51 : vector<2x8x8xf32> to vector<2x8x8xbf16>
    %55 = arith.truncf %52 : vector<2x8x8xf32> to vector<2x8x8xbf16>
    "tpu.trace_start"() <{level = 10 : i32, message = "bqd,bkd->bqk"}> : () -> ()
    %cst_24 = arith.constant dense<0.000000e+00> : vector<2x8x8xf32>
    %56 = tpu.matmul %54, %55, %cst_24 {dimension_numbers = #tpu.dot_dimension_numbers<[2], [2], [1], [1], [0, 0, 0, 1, 1, 1], [0], [0]>} : vector<2x8x8xbf16>, vector<2x8x8xbf16>, vector<2x8x8xf32> -> vector<2x8x8xf32>
    "tpu.trace_stop"() : () -> ()
    %cst_25 = arith.constant 0.353553385 : f32
    %57 = vector.broadcast %cst_25 : f32 to vector<2x8x8xf32>
    %58 = arith.mulf %56, %57 : vector<2x8x8xf32>
    %59 = vector.broadcast %0 : vector<2x1x8xf32> to vector<2x8x8xf32>
    %60 = arith.addf %58, %59 : vector<2x8x8xf32>
    %cst_26 = arith.constant dense<0xFF800000> : vector<2x8xf32>
    %61 = vector.multi_reduction <maximumf>, %60, %cst_26 [2] : vector<2x8x8xf32> to vector<2x8xf32>
    %62 = vector.shape_cast %61 : vector<2x8xf32> to vector<2x8x1xf32>
    %63 = vector.broadcast %62 : vector<2x8x1xf32> to vector<2x8x8xf32>
    %64 = arith.subf %60, %63 : vector<2x8x8xf32>
    %65 = math.exp %64 : vector<2x8x8xf32>
    %cst_27 = arith.constant dense<0.000000e+00> : vector<2x8xf32>
    %66 = vector.multi_reduction <add>, %65, %cst_27 [2] : vector<2x8x8xf32> to vector<2x8xf32>
    %67 = vector.shape_cast %66 : vector<2x8xf32> to vector<2x8x1xf32>
    %68 = tpu.reciprocal %67 {approx = true} : vector<2x8x1xf32> -> vector<2x8x1xf32>
    %69 = vector.broadcast %68 : vector<2x8x1xf32> to vector<2x8x8xf32>
    %70 = arith.mulf %65, %69 : vector<2x8x8xf32>
    %71 = arith.truncf %70 : vector<2x8x8xf32> to vector<2x8x8xbf16>
    %72 = arith.truncf %53 : vector<2x8x8xf32> to vector<2x8x8xbf16>
    "tpu.trace_start"() <{level = 10 : i32, message = "bqk,bkd->bqd"}> : () -> ()
    %cst_28 = arith.constant dense<0.000000e+00> : vector<2x8x8xf32>
    %73 = tpu.matmul %71, %72, %cst_28 {dimension_numbers = #tpu.dot_dimension_numbers<[2], [1], [1], [2], [0, 0, 0, 1, 1, 2], [0], [0]>} : vector<2x8x8xbf16>, vector<2x8x8xbf16>, vector<2x8x8xf32> -> vector<2x8x8xf32>
    "tpu.trace_stop"() : () -> ()
    %74 = vector.shape_cast %73 : vector<2x8x8xf32> to vector<16x8xf32>
    %75 = arith.truncf %74 : vector<16x8xf32> to vector<16x8xbf16>
    %76 = vector.extract_strided_slice %12 {offsets = [8, 0], sizes = [8, 32], strides = [1, 1]} : vector<32x32xbf16> to vector<8x32xbf16>
    %cst_29 = arith.constant dense<0.000000e+00> : vector<16x32xf32>
    %77 = tpu.matmul %75, %76, %cst_29 {dimension_numbers = #tpu.dot_dimension_numbers<[1], [0], [0], [1], [0, 0, 1, 1], [], []>} : vector<16x8xbf16>, vector<8x32xbf16>, vector<16x32xf32> -> vector<16x32xf32>
    %78 = arith.addf %50, %77 : vector<16x32xf32>
    %79 = vector.extract_strided_slice %21 {offsets = [0, 0, 16], sizes = [2, 8, 8], strides = [1, 1, 1]} : vector<2x8x96xf32> to vector<2x8x8xf32>
    %80 = vector.extract_strided_slice %21 {offsets = [0, 0, 48], sizes = [2, 8, 8], strides = [1, 1, 1]} : vector<2x8x96xf32> to vector<2x8x8xf32>
    %81 = vector.extract_strided_slice %21 {offsets = [0, 0, 80], sizes = [2, 8, 8], strides = [1, 1, 1]} : vector<2x8x96xf32> to vector<2x8x8xf32>
    %82 = arith.truncf %79 : vector<2x8x8xf32> to vector<2x8x8xbf16>
    %83 = arith.truncf %80 : vector<2x8x8xf32> to vector<2x8x8xbf16>
    "tpu.trace_start"() <{level = 10 : i32, message = "bqd,bkd->bqk"}> : () -> ()
    %cst_30 = arith.constant dense<0.000000e+00> : vector<2x8x8xf32>
    %84 = tpu.matmul %82, %83, %cst_30 {dimension_numbers = #tpu.dot_dimension_numbers<[2], [2], [1], [1], [0, 0, 0, 1, 1, 1], [0], [0]>} : vector<2x8x8xbf16>, vector<2x8x8xbf16>, vector<2x8x8xf32> -> vector<2x8x8xf32>
    "tpu.trace_stop"() : () -> ()
    %cst_31 = arith.constant 0.353553385 : f32
    %85 = vector.broadcast %cst_31 : f32 to vector<2x8x8xf32>
    %86 = arith.mulf %84, %85 : vector<2x8x8xf32>
    %87 = vector.broadcast %0 : vector<2x1x8xf32> to vector<2x8x8xf32>
    %88 = arith.addf %86, %87 : vector<2x8x8xf32>
    %cst_32 = arith.constant dense<0xFF800000> : vector<2x8xf32>
    %89 = vector.multi_reduction <maximumf>, %88, %cst_32 [2] : vector<2x8x8xf32> to vector<2x8xf32>
    %90 = vector.shape_cast %89 : vector<2x8xf32> to vector<2x8x1xf32>
    %91 = vector.broadcast %90 : vector<2x8x1xf32> to vector<2x8x8xf32>
    %92 = arith.subf %88, %91 : vector<2x8x8xf32>
    %93 = math.exp %92 : vector<2x8x8xf32>
    %cst_33 = arith.constant dense<0.000000e+00> : vector<2x8xf32>
    %94 = vector.multi_reduction <add>, %93, %cst_33 [2] : vector<2x8x8xf32> to vector<2x8xf32>
    %95 = vector.shape_cast %94 : vector<2x8xf32> to vector<2x8x1xf32>
    %96 = tpu.reciprocal %95 {approx = true} : vector<2x8x1xf32> -> vector<2x8x1xf32>
    %97 = vector.broadcast %96 : vector<2x8x1xf32> to vector<2x8x8xf32>
    %98 = arith.mulf %93, %97 : vector<2x8x8xf32>
    %99 = arith.truncf %98 : vector<2x8x8xf32> to vector<2x8x8xbf16>
    %100 = arith.truncf %81 : vector<2x8x8xf32> to vector<2x8x8xbf16>
    "tpu.trace_start"() <{level = 10 : i32, message = "bqk,bkd->bqd"}> : () -> ()
    %cst_34 = arith.constant dense<0.000000e+00> : vector<2x8x8xf32>
    %101 = tpu.matmul %99, %100, %cst_34 {dimension_numbers = #tpu.dot_dimension_numbers<[2], [1], [1], [2], [0, 0, 0, 1, 1, 2], [0], [0]>} : vector<2x8x8xbf16>, vector<2x8x8xbf16>, vector<2x8x8xf32> -> vector<2x8x8xf32>
    "tpu.trace_stop"() : () -> ()
    %102 = vector.shape_cast %101 : vector<2x8x8xf32> to vector<16x8xf32>
    %103 = arith.truncf %102 : vector<16x8xf32> to vector<16x8xbf16>
    %104 = vector.extract_strided_slice %12 {offsets = [16, 0], sizes = [8, 32], strides = [1, 1]} : vector<32x32xbf16> to vector<8x32xbf16>
    %cst_35 = arith.constant dense<0.000000e+00> : vector<16x32xf32>
    %105 = tpu.matmul %103, %104, %cst_35 {dimension_numbers = #tpu.dot_dimension_numbers<[1], [0], [0], [1], [0, 0, 1, 1], [], []>} : vector<16x8xbf16>, vector<8x32xbf16>, vector<16x32xf32> -> vector<16x32xf32>
    %106 = arith.addf %78, %105 : vector<16x32xf32>
    %107 = vector.extract_strided_slice %21 {offsets = [0, 0, 24], sizes = [2, 8, 8], strides = [1, 1, 1]} : vector<2x8x96xf32> to vector<2x8x8xf32>
    %108 = vector.extract_strided_slice %21 {offsets = [0, 0, 56], sizes = [2, 8, 8], strides = [1, 1, 1]} : vector<2x8x96xf32> to vector<2x8x8xf32>
    %109 = vector.extract_strided_slice %21 {offsets = [0, 0, 88], sizes = [2, 8, 8], strides = [1, 1, 1]} : vector<2x8x96xf32> to vector<2x8x8xf32>
    %110 = arith.truncf %107 : vector<2x8x8xf32> to vector<2x8x8xbf16>
    %111 = arith.truncf %108 : vector<2x8x8xf32> to vector<2x8x8xbf16>
    "tpu.trace_start"() <{level = 10 : i32, message = "bqd,bkd->bqk"}> : () -> ()
    %cst_36 = arith.constant dense<0.000000e+00> : vector<2x8x8xf32>
    %112 = tpu.matmul %110, %111, %cst_36 {dimension_numbers = #tpu.dot_dimension_numbers<[2], [2], [1], [1], [0, 0, 0, 1, 1, 1], [0], [0]>} : vector<2x8x8xbf16>, vector<2x8x8xbf16>, vector<2x8x8xf32> -> vector<2x8x8xf32>
    "tpu.trace_stop"() : () -> ()
    %cst_37 = arith.constant 0.353553385 : f32
    %113 = vector.broadcast %cst_37 : f32 to vector<2x8x8xf32>
    %114 = arith.mulf %112, %113 : vector<2x8x8xf32>
    %115 = vector.broadcast %0 : vector<2x1x8xf32> to vector<2x8x8xf32>
    %116 = arith.addf %114, %115 : vector<2x8x8xf32>
    %cst_38 = arith.constant dense<0xFF800000> : vector<2x8xf32>
    %117 = vector.multi_reduction <maximumf>, %116, %cst_38 [2] : vector<2x8x8xf32> to vector<2x8xf32>
    %118 = vector.shape_cast %117 : vector<2x8xf32> to vector<2x8x1xf32>
    %119 = vector.broadcast %118 : vector<2x8x1xf32> to vector<2x8x8xf32>
    %120 = arith.subf %116, %119 : vector<2x8x8xf32>
    %121 = math.exp %120 : vector<2x8x8xf32>
    %cst_39 = arith.constant dense<0.000000e+00> : vector<2x8xf32>
    %122 = vector.multi_reduction <add>, %121, %cst_39 [2] : vector<2x8x8xf32> to vector<2x8xf32>
    %123 = vector.shape_cast %122 : vector<2x8xf32> to vector<2x8x1xf32>
    %124 = tpu.reciprocal %123 {approx = true} : vector<2x8x1xf32> -> vector<2x8x1xf32>
    %125 = vector.broadcast %124 : vector<2x8x1xf32> to vector<2x8x8xf32>
    %126 = arith.mulf %121, %125 : vector<2x8x8xf32>
    %127 = arith.truncf %126 : vector<2x8x8xf32> to vector<2x8x8xbf16>
    %128 = arith.truncf %109 : vector<2x8x8xf32> to vector<2x8x8xbf16>
    "tpu.trace_start"() <{level = 10 : i32, message = "bqk,bkd->bqd"}> : () -> ()
    %cst_40 = arith.constant dense<0.000000e+00> : vector<2x8x8xf32>
    %129 = tpu.matmul %127, %128, %cst_40 {dimension_numbers = #tpu.dot_dimension_numbers<[2], [1], [1], [2], [0, 0, 0, 1, 1, 2], [0], [0]>} : vector<2x8x8xbf16>, vector<2x8x8xbf16>, vector<2x8x8xf32> -> vector<2x8x8xf32>
    "tpu.trace_stop"() : () -> ()
    %130 = vector.shape_cast %129 : vector<2x8x8xf32> to vector<16x8xf32>
    %131 = arith.truncf %130 : vector<16x8xf32> to vector<16x8xbf16>
    %132 = vector.extract_strided_slice %12 {offsets = [24, 0], sizes = [8, 32], strides = [1, 1]} : vector<32x32xbf16> to vector<8x32xbf16>
    %cst_41 = arith.constant dense<0.000000e+00> : vector<16x32xf32>
    %133 = tpu.matmul %131, %132, %cst_41 {dimension_numbers = #tpu.dot_dimension_numbers<[1], [0], [0], [1], [0, 0, 1, 1], [], []>} : vector<16x8xbf16>, vector<8x32xbf16>, vector<16x32xf32> -> vector<16x32xf32>
    %134 = arith.addf %106, %133 : vector<16x32xf32>
    %135 = vector.broadcast %5 : vector<1x32xf32> to vector<16x32xf32>
    %136 = arith.addf %134, %135 : vector<16x32xf32>
    %137 = arith.addf %2, %136 : vector<16x32xf32>
    %cst_42 = arith.constant dense<0.000000e+00> : vector<16xf32>
    %138 = vector.multi_reduction <add>, %137, %cst_42 [1] : vector<16x32xf32> to vector<16xf32>
    %139 = vector.shape_cast %138 : vector<16xf32> to vector<16x1xf32>
    %cst_43 = arith.constant 3.200000e+01 : f32
    %140 = vector.broadcast %cst_43 : f32 to vector<16x1xf32>
    %141 = arith.divf %139, %140 : vector<16x1xf32>
    %142 = vector.broadcast %141 : vector<16x1xf32> to vector<16x32xf32>
    %143 = arith.subf %137, %142 : vector<16x32xf32>
    %144 = arith.mulf %143, %143 : vector<16x32xf32>
    %cst_44 = arith.constant dense<0.000000e+00> : vector<16xf32>
    %145 = vector.multi_reduction <add>, %144, %cst_44 [1] : vector<16x32xf32> to vector<16xf32>
    %146 = vector.shape_cast %145 : vector<16xf32> to vector<16x1xf32>
    %cst_45 = arith.constant 3.200000e+01 : f32
    %147 = vector.broadcast %cst_45 : f32 to vector<16x1xf32>
    %148 = arith.divf %146, %147 : vector<16x1xf32>
    %149 = vector.broadcast %141 : vector<16x1xf32> to vector<16x32xf32>
    %150 = arith.subf %137, %149 : vector<16x32xf32>
    %cst_46 = arith.constant 9.99999974E-6 : f32
    %151 = vector.broadcast %cst_46 : f32 to vector<16x1xf32>
    %152 = arith.addf %148, %151 : vector<16x1xf32>
    %153 = math.rsqrt %152 : vector<16x1xf32>
    %154 = vector.broadcast %153 : vector<16x1xf32> to vector<16x32xf32>
    %155 = arith.mulf %150, %154 : vector<16x32xf32>
    %156 = vector.broadcast %7 : vector<1x32xf32> to vector<16x32xf32>
    %157 = arith.mulf %155, %156 : vector<16x32xf32>
    %158 = vector.broadcast %8 : vector<1x32xf32> to vector<16x32xf32>
    %159 = arith.addf %157, %158 : vector<16x32xf32>
    %160 = arith.truncf %159 : vector<16x32xf32> to vector<16x32xbf16>
    %c0_47 = arith.constant 0 : index
    %c0_48 = arith.constant 0 : index
    %c0_49 = arith.constant 0 : index
    %161 = vector.load %arg6[%c0_47, %c0_48, %c0_49] : memref<2x32x64xbf16, #tpu.memory_space<vmem>>, vector<1x32x64xbf16>
    %162 = vector.shape_cast %161 : vector<1x32x64xbf16> to vector<32x64xbf16>
    %cst_50 = arith.constant dense<0.000000e+00> : vector<16x64xf32>
    %163 = tpu.matmul %160, %162, %cst_50 {dimension_numbers = #tpu.dot_dimension_numbers<[1], [0], [0], [1], [0, 0, 1, 1], [], []>} : vector<16x32xbf16>, vector<32x64xbf16>, vector<16x64xf32> -> vector<16x64xf32>
    %c0_51 = arith.constant 0 : index
    %c0_52 = arith.constant 0 : index
    %c0_53 = arith.constant 0 : index
    %164 = vector.load %arg7[%c0_51, %c0_52, %c0_53] : memref<2x1x64xf32, #tpu.memory_space<vmem>>, vector<1x1x64xf32>
    %165 = vector.shape_cast %164 : vector<1x1x64xf32> to vector<1x64xf32>
    %166 = vector.broadcast %165 : vector<1x64xf32> to vector<16x64xf32>
    %167 = arith.addf %163, %166 : vector<16x64xf32>
    %cst_54 = arith.constant 0.000000e+00 : f32
    %168 = vector.broadcast %cst_54 : f32 to vector<16x64xf32>
    %169 = arith.maximumf %167, %168 : vector<16x64xf32>
    %170 = arith.truncf %169 : vector<16x64xf32> to vector<16x64xbf16>
    %c0_55 = arith.constant 0 : index
    %c0_56 = arith.constant 0 : index
    %c0_57 = arith.constant 0 : index
    %171 = vector.load %arg8[%c0_55, %c0_56, %c0_57] : memref<2x64x32xbf16, #tpu.memory_space<vmem>>, vector<1x64x32xbf16>
    %172 = vector.shape_cast %171 : vector<1x64x32xbf16> to vector<64x32xbf16>
    %cst_58 = arith.constant dense<0.000000e+00> : vector<16x32xf32>
    %173 = tpu.matmul %170, %172, %cst_58 {dimension_numbers = #tpu.dot_dimension_numbers<[1], [0], [0], [1], [0, 0, 1, 1], [], []>} : vector<16x64xbf16>, vector<64x32xbf16>, vector<16x32xf32> -> vector<16x32xf32>
    %174 = vector.broadcast %6 : vector<1x32xf32> to vector<16x32xf32>
    %175 = arith.addf %173, %174 : vector<16x32xf32>
    %176 = arith.addf %159, %175 : vector<16x32xf32>
    %cst_59 = arith.constant dense<0.000000e+00> : vector<16xf32>
    %177 = vector.multi_reduction <add>, %176, %cst_59 [1] : vector<16x32xf32> to vector<16xf32>
    %178 = vector.shape_cast %177 : vector<16xf32> to vector<16x1xf32>
    %cst_60 = arith.constant 3.200000e+01 : f32
    %179 = vector.broadcast %cst_60 : f32 to vector<16x1xf32>
    %180 = arith.divf %178, %179 : vector<16x1xf32>
    %181 = vector.broadcast %180 : vector<16x1xf32> to vector<16x32xf32>
    %182 = arith.subf %176, %181 : vector<16x32xf32>
    %183 = arith.mulf %182, %182 : vector<16x32xf32>
    %cst_61 = arith.constant dense<0.000000e+00> : vector<16xf32>
    %184 = vector.multi_reduction <add>, %183, %cst_61 [1] : vector<16x32xf32> to vector<16xf32>
    %185 = vector.shape_cast %184 : vector<16xf32> to vector<16x1xf32>
    %cst_62 = arith.constant 3.200000e+01 : f32
    %186 = vector.broadcast %cst_62 : f32 to vector<16x1xf32>
    %187 = arith.divf %185, %186 : vector<16x1xf32>
    %188 = vector.broadcast %180 : vector<16x1xf32> to vector<16x32xf32>
    %189 = arith.subf %176, %188 : vector<16x32xf32>
    %cst_63 = arith.constant 9.99999974E-6 : f32
    %190 = vector.broadcast %cst_63 : f32 to vector<16x1xf32>
    %191 = arith.addf %187, %190 : vector<16x1xf32>
    %192 = math.rsqrt %191 : vector<16x1xf32>
    %193 = vector.broadcast %192 : vector<16x1xf32> to vector<16x32xf32>
    %194 = arith.mulf %189, %193 : vector<16x32xf32>
    %195 = vector.broadcast %9 : vector<1x32xf32> to vector<16x32xf32>
    %196 = arith.mulf %194, %195 : vector<16x32xf32>
    %197 = vector.broadcast %10 : vector<1x32xf32> to vector<16x32xf32>
    %198 = arith.addf %196, %197 : vector<16x32xf32>
    %c1 = arith.constant 1 : index
    %c0_64 = arith.constant 0 : index
    %c0_65 = arith.constant 0 : index
    %199 = vector.load %arg9[%c1, %c0_64, %c0_65] : memref<2x6x32xf32, #tpu.memory_space<vmem>>, vector<1x6x32xf32>
    %200 = vector.shape_cast %199 : vector<1x6x32xf32> to vector<6x32xf32>
    %201 = vector.extract_strided_slice %200 {offsets = [0, 0], sizes = [1, 32], strides = [1, 1]} : vector<6x32xf32> to vector<1x32xf32>
    %202 = vector.extract_strided_slice %200 {offsets = [1, 0], sizes = [1, 32], strides = [1, 1]} : vector<6x32xf32> to vector<1x32xf32>
    %203 = vector.extract_strided_slice %200 {offsets = [2, 0], sizes = [1, 32], strides = [1, 1]} : vector<6x32xf32> to vector<1x32xf32>
    %204 = vector.extract_strided_slice %200 {offsets = [3, 0], sizes = [1, 32], strides = [1, 1]} : vector<6x32xf32> to vector<1x32xf32>
    %205 = vector.extract_strided_slice %200 {offsets = [4, 0], sizes = [1, 32], strides = [1, 1]} : vector<6x32xf32> to vector<1x32xf32>
    %206 = vector.extract_strided_slice %200 {offsets = [5, 0], sizes = [1, 32], strides = [1, 1]} : vector<6x32xf32> to vector<1x32xf32>
    %c1_66 = arith.constant 1 : index
    %c0_67 = arith.constant 0 : index
    %c0_68 = arith.constant 0 : index
    %207 = vector.load %arg5[%c1_66, %c0_67, %c0_68] : memref<2x32x32xbf16, #tpu.memory_space<vmem>>, vector<1x32x32xbf16>
    %208 = vector.shape_cast %207 : vector<1x32x32xbf16> to vector<32x32xbf16>
    %209 = arith.truncf %198 : vector<16x32xf32> to vector<16x32xbf16>
    %c1_69 = arith.constant 1 : index
    %c0_70 = arith.constant 0 : index
    %c0_71 = arith.constant 0 : index
    %210 = vector.load %arg3[%c1_69, %c0_70, %c0_71] : memref<2x32x96xbf16, #tpu.memory_space<vmem>>, vector<1x32x96xbf16>
    %211 = vector.shape_cast %210 : vector<1x32x96xbf16> to vector<32x96xbf16>
    %cst_72 = arith.constant dense<0.000000e+00> : vector<16x96xf32>
    %212 = tpu.matmul %209, %211, %cst_72 {dimension_numbers = #tpu.dot_dimension_numbers<[1], [0], [0], [1], [0, 0, 1, 1], [], []>} : vector<16x32xbf16>, vector<32x96xbf16>, vector<16x96xf32> -> vector<16x96xf32>
    %c1_73 = arith.constant 1 : index
    %c0_74 = arith.constant 0 : index
    %c0_75 = arith.constant 0 : index
    %213 = vector.load %arg4[%c1_73, %c0_74, %c0_75] : memref<2x1x96xf32, #tpu.memory_space<vmem>>, vector<1x1x96xf32>
    %214 = vector.shape_cast %213 : vector<1x1x96xf32> to vector<1x96xf32>
    %215 = vector.broadcast %214 : vector<1x96xf32> to vector<16x96xf32>
    %216 = arith.addf %212, %215 : vector<16x96xf32>
    %217 = vector.shape_cast %216 : vector<16x96xf32> to vector<2x8x96xf32>
    %cst_76 = arith.constant 0.000000e+00 : f32
    %218 = vector.broadcast %cst_76 : f32 to vector<16x32xf32>
    %219 = vector.extract_strided_slice %217 {offsets = [0, 0, 0], sizes = [2, 8, 8], strides = [1, 1, 1]} : vector<2x8x96xf32> to vector<2x8x8xf32>
    %220 = vector.extract_strided_slice %217 {offsets = [0, 0, 32], sizes = [2, 8, 8], strides = [1, 1, 1]} : vector<2x8x96xf32> to vector<2x8x8xf32>
    %221 = vector.extract_strided_slice %217 {offsets = [0, 0, 64], sizes = [2, 8, 8], strides = [1, 1, 1]} : vector<2x8x96xf32> to vector<2x8x8xf32>
    %222 = arith.truncf %219 : vector<2x8x8xf32> to vector<2x8x8xbf16>
    %223 = arith.truncf %220 : vector<2x8x8xf32> to vector<2x8x8xbf16>
    "tpu.trace_start"() <{level = 10 : i32, message = "bqd,bkd->bqk"}> : () -> ()
    %cst_77 = arith.constant dense<0.000000e+00> : vector<2x8x8xf32>
    %224 = tpu.matmul %222, %223, %cst_77 {dimension_numbers = #tpu.dot_dimension_numbers<[2], [2], [1], [1], [0, 0, 0, 1, 1, 1], [0], [0]>} : vector<2x8x8xbf16>, vector<2x8x8xbf16>, vector<2x8x8xf32> -> vector<2x8x8xf32>
    "tpu.trace_stop"() : () -> ()
    %cst_78 = arith.constant 0.353553385 : f32
    %225 = vector.broadcast %cst_78 : f32 to vector<2x8x8xf32>
    %226 = arith.mulf %224, %225 : vector<2x8x8xf32>
    %227 = vector.broadcast %0 : vector<2x1x8xf32> to vector<2x8x8xf32>
    %228 = arith.addf %226, %227 : vector<2x8x8xf32>
    %cst_79 = arith.constant dense<0xFF800000> : vector<2x8xf32>
    %229 = vector.multi_reduction <maximumf>, %228, %cst_79 [2] : vector<2x8x8xf32> to vector<2x8xf32>
    %230 = vector.shape_cast %229 : vector<2x8xf32> to vector<2x8x1xf32>
    %231 = vector.broadcast %230 : vector<2x8x1xf32> to vector<2x8x8xf32>
    %232 = arith.subf %228, %231 : vector<2x8x8xf32>
    %233 = math.exp %232 : vector<2x8x8xf32>
    %cst_80 = arith.constant dense<0.000000e+00> : vector<2x8xf32>
    %234 = vector.multi_reduction <add>, %233, %cst_80 [2] : vector<2x8x8xf32> to vector<2x8xf32>
    %235 = vector.shape_cast %234 : vector<2x8xf32> to vector<2x8x1xf32>
    %236 = tpu.reciprocal %235 {approx = true} : vector<2x8x1xf32> -> vector<2x8x1xf32>
    %237 = vector.broadcast %236 : vector<2x8x1xf32> to vector<2x8x8xf32>
    %238 = arith.mulf %233, %237 : vector<2x8x8xf32>
    %239 = arith.truncf %238 : vector<2x8x8xf32> to vector<2x8x8xbf16>
    %240 = arith.truncf %221 : vector<2x8x8xf32> to vector<2x8x8xbf16>
    "tpu.trace_start"() <{level = 10 : i32, message = "bqk,bkd->bqd"}> : () -> ()
    %cst_81 = arith.constant dense<0.000000e+00> : vector<2x8x8xf32>
    %241 = tpu.matmul %239, %240, %cst_81 {dimension_numbers = #tpu.dot_dimension_numbers<[2], [1], [1], [2], [0, 0, 0, 1, 1, 2], [0], [0]>} : vector<2x8x8xbf16>, vector<2x8x8xbf16>, vector<2x8x8xf32> -> vector<2x8x8xf32>
    "tpu.trace_stop"() : () -> ()
    %242 = vector.shape_cast %241 : vector<2x8x8xf32> to vector<16x8xf32>
    %243 = arith.truncf %242 : vector<16x8xf32> to vector<16x8xbf16>
    %244 = vector.extract_strided_slice %208 {offsets = [0, 0], sizes = [8, 32], strides = [1, 1]} : vector<32x32xbf16> to vector<8x32xbf16>
    %cst_82 = arith.constant dense<0.000000e+00> : vector<16x32xf32>
    %245 = tpu.matmul %243, %244, %cst_82 {dimension_numbers = #tpu.dot_dimension_numbers<[1], [0], [0], [1], [0, 0, 1, 1], [], []>} : vector<16x8xbf16>, vector<8x32xbf16>, vector<16x32xf32> -> vector<16x32xf32>
    %246 = arith.addf %218, %245 : vector<16x32xf32>
    %247 = vector.extract_strided_slice %217 {offsets = [0, 0, 8], sizes = [2, 8, 8], strides = [1, 1, 1]} : vector<2x8x96xf32> to vector<2x8x8xf32>
    %248 = vector.extract_strided_slice %217 {offsets = [0, 0, 40], sizes = [2, 8, 8], strides = [1, 1, 1]} : vector<2x8x96xf32> to vector<2x8x8xf32>
    %249 = vector.extract_strided_slice %217 {offsets = [0, 0, 72], sizes = [2, 8, 8], strides = [1, 1, 1]} : vector<2x8x96xf32> to vector<2x8x8xf32>
    %250 = arith.truncf %247 : vector<2x8x8xf32> to vector<2x8x8xbf16>
    %251 = arith.truncf %248 : vector<2x8x8xf32> to vector<2x8x8xbf16>
    "tpu.trace_start"() <{level = 10 : i32, message = "bqd,bkd->bqk"}> : () -> ()
    %cst_83 = arith.constant dense<0.000000e+00> : vector<2x8x8xf32>
    %252 = tpu.matmul %250, %251, %cst_83 {dimension_numbers = #tpu.dot_dimension_numbers<[2], [2], [1], [1], [0, 0, 0, 1, 1, 1], [0], [0]>} : vector<2x8x8xbf16>, vector<2x8x8xbf16>, vector<2x8x8xf32> -> vector<2x8x8xf32>
    "tpu.trace_stop"() : () -> ()
    %cst_84 = arith.constant 0.353553385 : f32
    %253 = vector.broadcast %cst_84 : f32 to vector<2x8x8xf32>
    %254 = arith.mulf %252, %253 : vector<2x8x8xf32>
    %255 = vector.broadcast %0 : vector<2x1x8xf32> to vector<2x8x8xf32>
    %256 = arith.addf %254, %255 : vector<2x8x8xf32>
    %cst_85 = arith.constant dense<0xFF800000> : vector<2x8xf32>
    %257 = vector.multi_reduction <maximumf>, %256, %cst_85 [2] : vector<2x8x8xf32> to vector<2x8xf32>
    %258 = vector.shape_cast %257 : vector<2x8xf32> to vector<2x8x1xf32>
    %259 = vector.broadcast %258 : vector<2x8x1xf32> to vector<2x8x8xf32>
    %260 = arith.subf %256, %259 : vector<2x8x8xf32>
    %261 = math.exp %260 : vector<2x8x8xf32>
    %cst_86 = arith.constant dense<0.000000e+00> : vector<2x8xf32>
    %262 = vector.multi_reduction <add>, %261, %cst_86 [2] : vector<2x8x8xf32> to vector<2x8xf32>
    %263 = vector.shape_cast %262 : vector<2x8xf32> to vector<2x8x1xf32>
    %264 = tpu.reciprocal %263 {approx = true} : vector<2x8x1xf32> -> vector<2x8x1xf32>
    %265 = vector.broadcast %264 : vector<2x8x1xf32> to vector<2x8x8xf32>
    %266 = arith.mulf %261, %265 : vector<2x8x8xf32>
    %267 = arith.truncf %266 : vector<2x8x8xf32> to vector<2x8x8xbf16>
    %268 = arith.truncf %249 : vector<2x8x8xf32> to vector<2x8x8xbf16>
    "tpu.trace_start"() <{level = 10 : i32, message = "bqk,bkd->bqd"}> : () -> ()
    %cst_87 = arith.constant dense<0.000000e+00> : vector<2x8x8xf32>
    %269 = tpu.matmul %267, %268, %cst_87 {dimension_numbers = #tpu.dot_dimension_numbers<[2], [1], [1], [2], [0, 0, 0, 1, 1, 2], [0], [0]>} : vector<2x8x8xbf16>, vector<2x8x8xbf16>, vector<2x8x8xf32> -> vector<2x8x8xf32>
    "tpu.trace_stop"() : () -> ()
    %270 = vector.shape_cast %269 : vector<2x8x8xf32> to vector<16x8xf32>
    %271 = arith.truncf %270 : vector<16x8xf32> to vector<16x8xbf16>
    %272 = vector.extract_strided_slice %208 {offsets = [8, 0], sizes = [8, 32], strides = [1, 1]} : vector<32x32xbf16> to vector<8x32xbf16>
    %cst_88 = arith.constant dense<0.000000e+00> : vector<16x32xf32>
    %273 = tpu.matmul %271, %272, %cst_88 {dimension_numbers = #tpu.dot_dimension_numbers<[1], [0], [0], [1], [0, 0, 1, 1], [], []>} : vector<16x8xbf16>, vector<8x32xbf16>, vector<16x32xf32> -> vector<16x32xf32>
    %274 = arith.addf %246, %273 : vector<16x32xf32>
    %275 = vector.extract_strided_slice %217 {offsets = [0, 0, 16], sizes = [2, 8, 8], strides = [1, 1, 1]} : vector<2x8x96xf32> to vector<2x8x8xf32>
    %276 = vector.extract_strided_slice %217 {offsets = [0, 0, 48], sizes = [2, 8, 8], strides = [1, 1, 1]} : vector<2x8x96xf32> to vector<2x8x8xf32>
    %277 = vector.extract_strided_slice %217 {offsets = [0, 0, 80], sizes = [2, 8, 8], strides = [1, 1, 1]} : vector<2x8x96xf32> to vector<2x8x8xf32>
    %278 = arith.truncf %275 : vector<2x8x8xf32> to vector<2x8x8xbf16>
    %279 = arith.truncf %276 : vector<2x8x8xf32> to vector<2x8x8xbf16>
    "tpu.trace_start"() <{level = 10 : i32, message = "bqd,bkd->bqk"}> : () -> ()
    %cst_89 = arith.constant dense<0.000000e+00> : vector<2x8x8xf32>
    %280 = tpu.matmul %278, %279, %cst_89 {dimension_numbers = #tpu.dot_dimension_numbers<[2], [2], [1], [1], [0, 0, 0, 1, 1, 1], [0], [0]>} : vector<2x8x8xbf16>, vector<2x8x8xbf16>, vector<2x8x8xf32> -> vector<2x8x8xf32>
    "tpu.trace_stop"() : () -> ()
    %cst_90 = arith.constant 0.353553385 : f32
    %281 = vector.broadcast %cst_90 : f32 to vector<2x8x8xf32>
    %282 = arith.mulf %280, %281 : vector<2x8x8xf32>
    %283 = vector.broadcast %0 : vector<2x1x8xf32> to vector<2x8x8xf32>
    %284 = arith.addf %282, %283 : vector<2x8x8xf32>
    %cst_91 = arith.constant dense<0xFF800000> : vector<2x8xf32>
    %285 = vector.multi_reduction <maximumf>, %284, %cst_91 [2] : vector<2x8x8xf32> to vector<2x8xf32>
    %286 = vector.shape_cast %285 : vector<2x8xf32> to vector<2x8x1xf32>
    %287 = vector.broadcast %286 : vector<2x8x1xf32> to vector<2x8x8xf32>
    %288 = arith.subf %284, %287 : vector<2x8x8xf32>
    %289 = math.exp %288 : vector<2x8x8xf32>
    %cst_92 = arith.constant dense<0.000000e+00> : vector<2x8xf32>
    %290 = vector.multi_reduction <add>, %289, %cst_92 [2] : vector<2x8x8xf32> to vector<2x8xf32>
    %291 = vector.shape_cast %290 : vector<2x8xf32> to vector<2x8x1xf32>
    %292 = tpu.reciprocal %291 {approx = true} : vector<2x8x1xf32> -> vector<2x8x1xf32>
    %293 = vector.broadcast %292 : vector<2x8x1xf32> to vector<2x8x8xf32>
    %294 = arith.mulf %289, %293 : vector<2x8x8xf32>
    %295 = arith.truncf %294 : vector<2x8x8xf32> to vector<2x8x8xbf16>
    %296 = arith.truncf %277 : vector<2x8x8xf32> to vector<2x8x8xbf16>
    "tpu.trace_start"() <{level = 10 : i32, message = "bqk,bkd->bqd"}> : () -> ()
    %cst_93 = arith.constant dense<0.000000e+00> : vector<2x8x8xf32>
    %297 = tpu.matmul %295, %296, %cst_93 {dimension_numbers = #tpu.dot_dimension_numbers<[2], [1], [1], [2], [0, 0, 0, 1, 1, 2], [0], [0]>} : vector<2x8x8xbf16>, vector<2x8x8xbf16>, vector<2x8x8xf32> -> vector<2x8x8xf32>
    "tpu.trace_stop"() : () -> ()
    %298 = vector.shape_cast %297 : vector<2x8x8xf32> to vector<16x8xf32>
    %299 = arith.truncf %298 : vector<16x8xf32> to vector<16x8xbf16>
    %300 = vector.extract_strided_slice %208 {offsets = [16, 0], sizes = [8, 32], strides = [1, 1]} : vector<32x32xbf16> to vector<8x32xbf16>
    %cst_94 = arith.constant dense<0.000000e+00> : vector<16x32xf32>
    %301 = tpu.matmul %299, %300, %cst_94 {dimension_numbers = #tpu.dot_dimension_numbers<[1], [0], [0], [1], [0, 0, 1, 1], [], []>} : vector<16x8xbf16>, vector<8x32xbf16>, vector<16x32xf32> -> vector<16x32xf32>
    %302 = arith.addf %274, %301 : vector<16x32xf32>
    %303 = vector.extract_strided_slice %217 {offsets = [0, 0, 24], sizes = [2, 8, 8], strides = [1, 1, 1]} : vector<2x8x96xf32> to vector<2x8x8xf32>
    %304 = vector.extract_strided_slice %217 {offsets = [0, 0, 56], sizes = [2, 8, 8], strides = [1, 1, 1]} : vector<2x8x96xf32> to vector<2x8x8xf32>
    %305 = vector.extract_strided_slice %217 {offsets = [0, 0, 88], sizes = [2, 8, 8], strides = [1, 1, 1]} : vector<2x8x96xf32> to vector<2x8x8xf32>
    %306 = arith.truncf %303 : vector<2x8x8xf32> to vector<2x8x8xbf16>
    %307 = arith.truncf %304 : vector<2x8x8xf32> to vector<2x8x8xbf16>
    "tpu.trace_start"() <{level = 10 : i32, message = "bqd,bkd->bqk"}> : () -> ()
    %cst_95 = arith.constant dense<0.000000e+00> : vector<2x8x8xf32>
    %308 = tpu.matmul %306, %307, %cst_95 {dimension_numbers = #tpu.dot_dimension_numbers<[2], [2], [1], [1], [0, 0, 0, 1, 1, 1], [0], [0]>} : vector<2x8x8xbf16>, vector<2x8x8xbf16>, vector<2x8x8xf32> -> vector<2x8x8xf32>
    "tpu.trace_stop"() : () -> ()
    %cst_96 = arith.constant 0.353553385 : f32
    %309 = vector.broadcast %cst_96 : f32 to vector<2x8x8xf32>
    %310 = arith.mulf %308, %309 : vector<2x8x8xf32>
    %311 = vector.broadcast %0 : vector<2x1x8xf32> to vector<2x8x8xf32>
    %312 = arith.addf %310, %311 : vector<2x8x8xf32>
    %cst_97 = arith.constant dense<0xFF800000> : vector<2x8xf32>
    %313 = vector.multi_reduction <maximumf>, %312, %cst_97 [2] : vector<2x8x8xf32> to vector<2x8xf32>
    %314 = vector.shape_cast %313 : vector<2x8xf32> to vector<2x8x1xf32>
    %315 = vector.broadcast %314 : vector<2x8x1xf32> to vector<2x8x8xf32>
    %316 = arith.subf %312, %315 : vector<2x8x8xf32>
    %317 = math.exp %316 : vector<2x8x8xf32>
    %cst_98 = arith.constant dense<0.000000e+00> : vector<2x8xf32>
    %318 = vector.multi_reduction <add>, %317, %cst_98 [2] : vector<2x8x8xf32> to vector<2x8xf32>
    %319 = vector.shape_cast %318 : vector<2x8xf32> to vector<2x8x1xf32>
    %320 = tpu.reciprocal %319 {approx = true} : vector<2x8x1xf32> -> vector<2x8x1xf32>
    %321 = vector.broadcast %320 : vector<2x8x1xf32> to vector<2x8x8xf32>
    %322 = arith.mulf %317, %321 : vector<2x8x8xf32>
    %323 = arith.truncf %322 : vector<2x8x8xf32> to vector<2x8x8xbf16>
    %324 = arith.truncf %305 : vector<2x8x8xf32> to vector<2x8x8xbf16>
    "tpu.trace_start"() <{level = 10 : i32, message = "bqk,bkd->bqd"}> : () -> ()
    %cst_99 = arith.constant dense<0.000000e+00> : vector<2x8x8xf32>
    %325 = tpu.matmul %323, %324, %cst_99 {dimension_numbers = #tpu.dot_dimension_numbers<[2], [1], [1], [2], [0, 0, 0, 1, 1, 2], [0], [0]>} : vector<2x8x8xbf16>, vector<2x8x8xbf16>, vector<2x8x8xf32> -> vector<2x8x8xf32>
    "tpu.trace_stop"() : () -> ()
    %326 = vector.shape_cast %325 : vector<2x8x8xf32> to vector<16x8xf32>
    %327 = arith.truncf %326 : vector<16x8xf32> to vector<16x8xbf16>
    %328 = vector.extract_strided_slice %208 {offsets = [24, 0], sizes = [8, 32], strides = [1, 1]} : vector<32x32xbf16> to vector<8x32xbf16>
    %cst_100 = arith.constant dense<0.000000e+00> : vector<16x32xf32>
    %329 = tpu.matmul %327, %328, %cst_100 {dimension_numbers = #tpu.dot_dimension_numbers<[1], [0], [0], [1], [0, 0, 1, 1], [], []>} : vector<16x8xbf16>, vector<8x32xbf16>, vector<16x32xf32> -> vector<16x32xf32>
    %330 = arith.addf %302, %329 : vector<16x32xf32>
    %331 = vector.broadcast %201 : vector<1x32xf32> to vector<16x32xf32>
    %332 = arith.addf %330, %331 : vector<16x32xf32>
    %333 = arith.addf %198, %332 : vector<16x32xf32>
    %cst_101 = arith.constant dense<0.000000e+00> : vector<16xf32>
    %334 = vector.multi_reduction <add>, %333, %cst_101 [1] : vector<16x32xf32> to vector<16xf32>
    %335 = vector.shape_cast %334 : vector<16xf32> to vector<16x1xf32>
    %cst_102 = arith.constant 3.200000e+01 : f32
    %336 = vector.broadcast %cst_102 : f32 to vector<16x1xf32>
    %337 = arith.divf %335, %336 : vector<16x1xf32>
    %338 = vector.broadcast %337 : vector<16x1xf32> to vector<16x32xf32>
    %339 = arith.subf %333, %338 : vector<16x32xf32>
    %340 = arith.mulf %339, %339 : vector<16x32xf32>
    %cst_103 = arith.constant dense<0.000000e+00> : vector<16xf32>
    %341 = vector.multi_reduction <add>, %340, %cst_103 [1] : vector<16x32xf32> to vector<16xf32>
    %342 = vector.shape_cast %341 : vector<16xf32> to vector<16x1xf32>
    %cst_104 = arith.constant 3.200000e+01 : f32
    %343 = vector.broadcast %cst_104 : f32 to vector<16x1xf32>
    %344 = arith.divf %342, %343 : vector<16x1xf32>
    %345 = vector.broadcast %337 : vector<16x1xf32> to vector<16x32xf32>
    %346 = arith.subf %333, %345 : vector<16x32xf32>
    %cst_105 = arith.constant 9.99999974E-6 : f32
    %347 = vector.broadcast %cst_105 : f32 to vector<16x1xf32>
    %348 = arith.addf %344, %347 : vector<16x1xf32>
    %349 = math.rsqrt %348 : vector<16x1xf32>
    %350 = vector.broadcast %349 : vector<16x1xf32> to vector<16x32xf32>
    %351 = arith.mulf %346, %350 : vector<16x32xf32>
    %352 = vector.broadcast %203 : vector<1x32xf32> to vector<16x32xf32>
    %353 = arith.mulf %351, %352 : vector<16x32xf32>
    %354 = vector.broadcast %204 : vector<1x32xf32> to vector<16x32xf32>
    %355 = arith.addf %353, %354 : vector<16x32xf32>
    %356 = arith.truncf %355 : vector<16x32xf32> to vector<16x32xbf16>
    %c1_106 = arith.constant 1 : index
    %c0_107 = arith.constant 0 : index
    %c0_108 = arith.constant 0 : index
    %357 = vector.load %arg6[%c1_106, %c0_107, %c0_108] : memref<2x32x64xbf16, #tpu.memory_space<vmem>>, vector<1x32x64xbf16>
    %358 = vector.shape_cast %357 : vector<1x32x64xbf16> to vector<32x64xbf16>
    %cst_109 = arith.constant dense<0.000000e+00> : vector<16x64xf32>
    %359 = tpu.matmul %356, %358, %cst_109 {dimension_numbers = #tpu.dot_dimension_numbers<[1], [0], [0], [1], [0, 0, 1, 1], [], []>} : vector<16x32xbf16>, vector<32x64xbf16>, vector<16x64xf32> -> vector<16x64xf32>
    %c1_110 = arith.constant 1 : index
    %c0_111 = arith.constant 0 : index
    %c0_112 = arith.constant 0 : index
    %360 = vector.load %arg7[%c1_110, %c0_111, %c0_112] : memref<2x1x64xf32, #tpu.memory_space<vmem>>, vector<1x1x64xf32>
    %361 = vector.shape_cast %360 : vector<1x1x64xf32> to vector<1x64xf32>
    %362 = vector.broadcast %361 : vector<1x64xf32> to vector<16x64xf32>
    %363 = arith.addf %359, %362 : vector<16x64xf32>
    %cst_113 = arith.constant 0.000000e+00 : f32
    %364 = vector.broadcast %cst_113 : f32 to vector<16x64xf32>
    %365 = arith.maximumf %363, %364 : vector<16x64xf32>
    %366 = arith.truncf %365 : vector<16x64xf32> to vector<16x64xbf16>
    %c1_114 = arith.constant 1 : index
    %c0_115 = arith.constant 0 : index
    %c0_116 = arith.constant 0 : index
    %367 = vector.load %arg8[%c1_114, %c0_115, %c0_116] : memref<2x64x32xbf16, #tpu.memory_space<vmem>>, vector<1x64x32xbf16>
    %368 = vector.shape_cast %367 : vector<1x64x32xbf16> to vector<64x32xbf16>
    %cst_117 = arith.constant dense<0.000000e+00> : vector<16x32xf32>
    %369 = tpu.matmul %366, %368, %cst_117 {dimension_numbers = #tpu.dot_dimension_numbers<[1], [0], [0], [1], [0, 0, 1, 1], [], []>} : vector<16x64xbf16>, vector<64x32xbf16>, vector<16x32xf32> -> vector<16x32xf32>
    %370 = vector.broadcast %202 : vector<1x32xf32> to vector<16x32xf32>
    %371 = arith.addf %369, %370 : vector<16x32xf32>
    %372 = arith.addf %355, %371 : vector<16x32xf32>
    %cst_118 = arith.constant dense<0.000000e+00> : vector<16xf32>
    %373 = vector.multi_reduction <add>, %372, %cst_118 [1] : vector<16x32xf32> to vector<16xf32>
    %374 = vector.shape_cast %373 : vector<16xf32> to vector<16x1xf32>
    %cst_119 = arith.constant 3.200000e+01 : f32
    %375 = vector.broadcast %cst_119 : f32 to vector<16x1xf32>
    %376 = arith.divf %374, %375 : vector<16x1xf32>
    %377 = vector.broadcast %376 : vector<16x1xf32> to vector<16x32xf32>
    %378 = arith.subf %372, %377 : vector<16x32xf32>
    %379 = arith.mulf %378, %378 : vector<16x32xf32>
    %cst_120 = arith.constant dense<0.000000e+00> : vector<16xf32>
    %380 = vector.multi_reduction <add>, %379, %cst_120 [1] : vector<16x32xf32> to vector<16xf32>
    %381 = vector.shape_cast %380 : vector<16xf32> to vector<16x1xf32>
    %cst_121 = arith.constant 3.200000e+01 : f32
    %382 = vector.broadcast %cst_121 : f32 to vector<16x1xf32>
    %383 = arith.divf %381, %382 : vector<16x1xf32>
    %384 = vector.broadcast %376 : vector<16x1xf32> to vector<16x32xf32>
    %385 = arith.subf %372, %384 : vector<16x32xf32>
    %cst_122 = arith.constant 9.99999974E-6 : f32
    %386 = vector.broadcast %cst_122 : f32 to vector<16x1xf32>
    %387 = arith.addf %383, %386 : vector<16x1xf32>
    %388 = math.rsqrt %387 : vector<16x1xf32>
    %389 = vector.broadcast %388 : vector<16x1xf32> to vector<16x32xf32>
    %390 = arith.mulf %385, %389 : vector<16x32xf32>
    %391 = vector.broadcast %205 : vector<1x32xf32> to vector<16x32xf32>
    %392 = arith.mulf %390, %391 : vector<16x32xf32>
    %393 = vector.broadcast %206 : vector<1x32xf32> to vector<16x32xf32>
    %394 = arith.addf %392, %393 : vector<16x32xf32>
    %c0_123 = arith.constant 0 : index
    %c0_124 = arith.constant 0 : index
    %c0_125 = arith.constant 0 : index
    %395 = vector.load %arg2[%c0_123, %c0_124, %c0_125] : memref<2x8x1xf32, #tpu.memory_space<vmem>>, vector<2x8x1xf32>
    %396 = vector.shape_cast %394 : vector<16x32xf32> to vector<2x8x32xf32>
    %397 = vector.broadcast %395 : vector<2x8x1xf32> to vector<2x8x32xf32>
    %398 = arith.mulf %396, %397 : vector<2x8x32xf32>
    %cst_126 = arith.constant dense<0.000000e+00> : vector<2x32xf32>
    %399 = vector.multi_reduction <add>, %398, %cst_126 [1] : vector<2x8x32xf32> to vector<2x32xf32>
    %cst_127 = arith.constant dense<0.000000e+00> : vector<2x1xf32>
    %400 = vector.multi_reduction <add>, %395, %cst_127 [1] : vector<2x8x1xf32> to vector<2x1xf32>
    %cst_128 = arith.constant 1.000000e+00 : f32
    %401 = vector.broadcast %cst_128 : f32 to vector<2x1xf32>
    %402 = arith.maximumf %400, %401 : vector<2x1xf32>
    %403 = tpu.reciprocal %402 {approx = true} : vector<2x1xf32> -> vector<2x1xf32>
    %404 = vector.broadcast %403 : vector<2x1xf32> to vector<2x32xf32>
    %405 = arith.mulf %399, %404 : vector<2x32xf32>
    %cst_129 = arith.constant 0.000000e+00 : f32
    %406 = vector.broadcast %cst_129 : f32 to vector<2x32xf32>
    %407 = arith.maximumf %405, %406 : vector<2x32xf32>
    %408 = arith.truncf %407 : vector<2x32xf32> to vector<2x32xbf16>
    %c0_130 = arith.constant 0 : index
    %c0_131 = arith.constant 0 : index
    %409 = vector.load %arg10[%c0_130, %c0_131] : memref<32x32xbf16, #tpu.memory_space<vmem>>, vector<32x32xbf16>
    %cst_132 = arith.constant dense<0.000000e+00> : vector<2x32xf32>
    %410 = tpu.matmul %408, %409, %cst_132 {dimension_numbers = #tpu.dot_dimension_numbers<[1], [0], [0], [1], [0, 0, 1, 1], [], []>} : vector<2x32xbf16>, vector<32x32xbf16>, vector<2x32xf32> -> vector<2x32xf32>
    %c0_133 = arith.constant 0 : index
    %c0_134 = arith.constant 0 : index
    %411 = vector.load %arg11[%c0_133, %c0_134] : memref<1x32xf32, #tpu.memory_space<vmem>>, vector<1x32xf32>
    %412 = vector.broadcast %411 : vector<1x32xf32> to vector<2x32xf32>
    %413 = arith.addf %410, %412 : vector<2x32xf32>
    %c0_135 = arith.constant 0 : index
    %c0_136 = arith.constant 0 : index
    %414 = vector.load %arg12[%c0_135, %c0_136] : memref<2x32xf32, #tpu.memory_space<vmem>>, vector<2x32xf32>
    tpu.vector_store %arg12[%c0_135, %c0_136], %413 {strides = array<i32>} : memref<2x32xf32, #tpu.memory_space<vmem>>, vector<2x32xf32>,
    return
  }
}

</mosaic_0001>

<bundles_post_ra>
// kernel: tpu_custom_call.1
= control target key start
LH: loop header
LB: loop body
LE: loop exit
PB: predicated region body
PF: predicated region fallthrough
CT: control target
= control target key end

     0   :  { %17 = vsyncpa [#allocation3], 0  ;;  %s4556_s0 = inlined_call_operand.vmem [shape: f32[2,8,32], index: 0, kind: input, shape index: {}]   ;;  %s4557_s1 = inlined_call_operand.hbm [shape: f32[2,1,8], index: 1, kind: input, shape index: {}]   ;;  %s4558_s2 = inlined_call_operand.vmem [shape: f32[2,8,1], index: 2, kind: input, shape index: {}]   ;;  %s4559_s3 = inlined_call_operand.vmem [shape: bf16[2,32,96], index: 3, kind: input, shape index: {}]   ;;  %s4560_s4 = inlined_call_operand.hbm [shape: f32[2,1,96], index: 4, kind: input, shape index: {}]   ;;  %s4561_s5 = inlined_call_operand.vmem [shape: bf16[2,32,32], index: 5, kind: input, shape index: {}]   ;;  %s4562_s6 = inlined_call_operand.vmem [shape: bf16[2,32,64], index: 6, kind: input, shape index: {}]   ;;  %s4563_s7 = inlined_call_operand.hbm [shape: f32[2,1,64], index: 7, kind: input, shape index: {}]   ;;  %s4564_s8 = inlined_call_operand.vmem [shape: bf16[2,64,32], index: 8, kind: input, shape index: {}]   ;;  %s4565_s9 = inlined_call_operand.vmem [shape: f32[2,6,32], index: 9, kind: input, shape index: {}]   ;;  %s4566_s10 = inlined_call_operand.vmem [shape: bf16[32,32], index: 10, kind: input, shape index: {}]   ;;  %s4567_s11 = inlined_call_operand.vmem [shape: f32[1,32], index: 11, kind: input, shape index: {}]   ;;  %s4568_s12 = inlined_call_operand.hbm [shape: f32[2,32], index: 12, kind: output, shape index: {}]  }
   0x1   :  { %18 = vsyncpa [#allocation6], 0 }
   0x2   :  { %19 = vsyncpa [#allocation4], 0  ;;  %s3792_s21 = smov [#allocation5]   ;;  %s3793_s23 = smov [#allocation2]  }
   0x3   :  { %s43_s22 = sshll.u32 %s3792_s21, 4  ;;  %s27_s24 = sshll.u32 %s3793_s23, 4  ;;  %s44_s22 = int_to_ptr.vmem [resolvable:$true] %s43_s22  ;;  %s3877_s24 = int_to_ptr.vmem [resolvable:$true] %s27_s24 }
   0x4   :  { %s3698_s27 = scalar_lea.hbm %s4560_s4, 32 }
   0x5   :  { %p3699_p0 = scmp.ne.s32.totalorder %s4560_s4, %s3698_s27  ;;  %p3702_p1 = scmp.lt.u32.totalorder %s3698_s27, %s4560_s4 }
   0x7   :  { %p3704_p2 = pnand %p3702_p1, %p3699_p0 }
   0x9   :  { %3707 = shalt.err (!%p3704_p2)
}
   0xa   :  { %s3708_s14 = scalar_lea.vmem %s44_s22, 32  ;;  %p3713_p4 = scmp.lt.s32.totalorder %s44_s22, %s44_s22 }
   0xb   :  { %p3709_p3 = scmp.ne.s32.totalorder %s44_s22, %s3708_s14  ;;  %p3714_p5 = scmp.lt.s32.totalorder %s3708_s14, %s3708_s14 }
   0xd   :  { %p3715_p6 = por %p3714_p5, %p3713_p4 }
   0xf   :  { %p3716_p7 = pnand %p3715_p6, %p3709_p3 }
  0x11   :  { %3719 = shalt.err (!%p3716_p7)
}
  0x12   :  { %s3794_s15 = smov 16   ;;  %s3795_s16 = smov 1  }
  0x13   :  { %49 = dma.hbm_to_vmem [thread:$0]  %s4560_s4, 32, %s44_s22, [#allocation6], %s3794_s15, %s3794_s15, %s3795_s16  }
  0x14   :  { %s3720_s21 = scalar_lea.hbm %s4557_s1, 32 }
  0x15   :  { %p3721_p8 = scmp.ne.s32.totalorder %s4557_s1, %s3720_s21  ;;  %p3724_p9 = scmp.lt.u32.totalorder %s3720_s21, %s4557_s1 }
  0x17   :  { %p3726_p10 = pnand %p3724_p9, %p3721_p8 }
  0x19   :  { %3729 = shalt.err (!%p3726_p10)
}
  0x1a   :  { %s3730_s28 = scalar_lea.vmem %s3877_s24, 32  ;;  %p3735_p12 = scmp.lt.s32.totalorder %s3877_s24, %s3877_s24 }
  0x1b   :  { %p3731_p11 = scmp.ne.s32.totalorder %s3877_s24, %s3730_s28  ;;  %p3736_p13 = scmp.lt.s32.totalorder %s3730_s28, %s3730_s28 }
  0x1d   :  { %p3737_p0 = por %p3736_p13, %p3735_p12 }
  0x1f   :  { %p3738_p1 = pnand %p3737_p0, %p3731_p11 }
  0x21   :  { %3741 = shalt.err (!%p3738_p1)
}
  0x22   :  { %33 = dma.hbm_to_vmem [thread:$0]  %s4557_s1, 32, %s3877_s24, [#allocation3], %s3794_s15, %s3794_s15, %s3795_s16  }
  0x23   :  { %s3796_s29 = smov [#allocation7]   ;;  %s3742_s17 = scalar_lea.hbm %s4563_s7, 32 }
  0x24   :  { %s59_s30 = sshll.u32 %s3796_s29, 4  ;;  %p3743_p2 = scmp.ne.s32.totalorder %s4563_s7, %s3742_s17  ;;  %s60_s30 = int_to_ptr.vmem [resolvable:$true] %s59_s30 }
  0x25   :  { %p3746_p3 = scmp.lt.u32.totalorder %s3742_s17, %s4563_s7 }
  0x27   :  { %p3748_p4 = pnand %p3746_p3, %p3743_p2 }
  0x29   :  { %3751 = shalt.err (!%p3748_p4)
}
  0x2a   :  { %s3752_s23 = scalar_lea.vmem %s60_s30, 32  ;;  %p3757_p6 = scmp.lt.s32.totalorder %s60_s30, %s60_s30 }
  0x2b   :  { %p3753_p5 = scmp.ne.s32.totalorder %s60_s30, %s3752_s23  ;;  %p3758_p7 = scmp.lt.s32.totalorder %s3752_s23, %s3752_s23 }
  0x2d   :  { %p3759_p8 = por %p3758_p7, %p3757_p6 }
  0x2f   :  { %p3760_p9 = pnand %p3759_p8, %p3753_p5 }
  0x31   :  { %3763 = shalt.err (!%p3760_p9)
}
  0x32   :  { %65 = dma.hbm_to_vmem [thread:$0]  %s4563_s7, 32, %s60_s30, [#allocation6], %s3794_s15, %s3794_s15, %s3795_s16  }
  0x33   :  { %3786 = dma.done.wait [#allocation3], 32  }
  0x34   :  { %3787 = vsyncadd [#allocation3], 4294967264 }
  0x35   :  { %3788 = dma.done.wait [#allocation6], 64  }
  0x36   :  { %3789 = vsyncadd [#allocation6], 4294967232  ;;  %v3797_v0 = vmov 0.0   ;;  %vm3798_vm0 = vmmov 0   ;;  %v3594_v1 = vld [vmem:[%s4559_s3] sm:$0xff]   ;;  %v3595_v2 = vld [vmem:[%s4559_s3 + $0x8] sm:$0xff]  }
  0x37   :  { %3268 = vmatprep.subr.bf16.mxu0 %v3797_v0  ;;  %3272 = vmatprep.mubr.msk.bf16.mxu0 %vm3798_vm0, %v3797_v0  ;;  %v3944_v3 = vld [vmem:[%s4556_s0] sm:$0xff]  ;;  %v3949_v4 = vld [vmem:[%s4556_s0 + $0x8] sm:$0xff]  ;;  %vm117_vm1 = vcmask 261120   ;;  %s3799_s0 = smov 96   ;;  %vm167_vm2 = vcmask 64512   ;;  %s3800_s22 = smov 64  }
  0x38   :  { %3276 = vmatprep.subr.bf16.mxu1 %v3797_v0  ;;  %3278 = vmatprep.mubr.msk.bf16.mxu1 %vm3798_vm0, %v3797_v0  ;;  %v93_v5 = vpack.c.bf16 %v3949_v4, %v3944_v3  ;;  %v3070_v6 = vld [vmem:[#allocation5] ss:$0 sm:$0xff]  ;;  %v3978_v20 = vld [vmem:[#allocation2] ss:$0 sm:$0xff]  ;;  %v3981_v27 = vld [vmem:[#allocation2 + $0x1] ss:$0 sm:$0xff] }
  0x39   :  { %3269 = vmatpush3.bf16.msra.mxu0 %v3594_v1  ;;  %s3801_s29 = smov 88   ;;  %vm308_vm3 = vcmask 1043456   ;;  %s3802_s30 = smov 120   ;;  %vm1422_vm4 = vcmask 523264   ;;  %vm2944_vm5 = vcmask 7168   ;;  %vm2994_vm6 = vcmask 1041409  }
  0x3a   :  { %3270 = vmatprep.subr.bf16.mxu0 %v3797_v0  ;;  %s3803_s13 = smov 56   ;;  %s3804_s14 = smov 112   ;;  %vm3052_vm7 = vcmask 254976  }
  0x3b   :  { %s3805_s17 = smov 80   ;;  %s3806_s23 = smov 48  }
  0x3c   :  { %s3807_s1 = smov 72   ;;  %s3808_s24 = smov 104  }
  0x3d   :  { %3271 = vmatpush3.bf16.msra.mxu0 %v3595_v2  ;;  %s3809_s7 = smov 40  }
  0x3e   :  { %3282 = vmatprep.subr.bf16.mxu0 %v3797_v0 }
  0x40   :  { %3273 = vmatmul.mubr.msk.bf16.vlgmr.msra.gmra.mrb[0].mxu0 %vm117_vm1, %v93_v5 }
  0x41   :  { %3284 = vmatprep.mubr.msk.bf16.mxu0 %vm3798_vm0, %v3797_v0 }
 0x113   :  { %v155_v7 = vpop.f32.mrb[0].mxu0 }
 0x114   :  { %v156_v8 = vadd.f32 %v3070_v6, %v155_v7  ;;  %v3274_v9 = vpop.f32.mrb[1].mxu0 }
 0x115   :  { %v158_v10 = vpop.f32.mrb[2].mxu0 }
 0x116   :  { %v3958_v11 = vpack.c.bf16 %v156_v8, %v156_v8  ;;  %v159_v12 = vadd.f32 %v3070_v6, %v158_v10  ;;  %v3275_v13 = vpop.f32.mrb[3].mxu0 }
 0x118   :  { %165 = vrot.lane.b32.xlu0 %v3958_v11, %s3799_s0  ;;  %v3962_v14 = vpack.c.bf16 %v159_v12, %v159_v12 }
 0x11c   :  { %215 = vrot.lane.b32.xlu0 %v3962_v14, %s3799_s0 }
 0x18a   :  { %v166_v15 = vpop.permute.xlu0 %165 }
 0x18b   :  { %v172_v16 = vsel %vm167_vm2, %v166_v15, 0 }
 0x18c   :  { %3277 = vmatpush3.bf16.xpose.msra.mxu1 %v172_v16 }
 0x18d   :  { %3288 = vmatprep.subr.bf16.mxu1 %v3797_v0 }
 0x18e   :  { %v216_v17 = vpop.permute.xlu0 %215 }
 0x18f   :  { %v221_v18 = vsel %vm167_vm2, %v216_v17, 0 }
 0x190   :  { %3283 = vmatpush3.bf16.xpose.msra.mxu0 %v221_v18 }
 0x191   :  { %3294 = vmatprep.subr.bf16.mxu0 %v3797_v0 }
 0x193   :  { %3279 = vmatmul.mubr.msk.bf16.vlgmr.msra.gmra.mrb[0].mxu1 %vm167_vm2, %v3958_v11 }
 0x194   :  { %3290 = vmatprep.mubr.msk.bf16.mxu1 %vm3798_vm0, %v3797_v0 }
 0x197   :  { %3285 = vmatmul.mubr.msk.bf16.vlgmr.msra.gmra.mrb[4].mxu0 %vm167_vm2, %v3962_v14 }
 0x198   :  { %3296 = vmatprep.mubr.msk.bf16.mxu0 %vm3798_vm0, %v3797_v0 }
 0x266   :  { %v208_v19 = vpop.f32.mrb[0].mxu1 }
 0x267   :  { %v263_v21 = vmul.f32 0.35355338, %v208_v19  ;;  %v3280_v22 = vpop.f32.mrb[1].mxu1 }
 0x268   :  { %v211_v23 = vpop.f32.mrb[2].mxu1 }
 0x269   :  { %v3281_v24 = vpop.f32.mrb[3].mxu1  ;;  %v277_v25 = vadd.f32 %v3978_v20, %v263_v21 }
 0x26a   :  { %v257_v26 = vpop.f32.mrb[4].mxu0 }
 0x26b   :  { %v264_v28 = vmul.f32 0.35355338, %v257_v26  ;;  %v3286_v29 = vpop.f32.mrb[5].mxu0  ;;  %v279_v30 = vsel %vm167_vm2, %v277_v25, -inf }
 0x26c   :  { %v260_v31 = vpop.f32.mrb[6].mxu0  ;;  %280 = vmax.xlane.f32.xlu1 %v279_v30 }
 0x26d   :  { %v3287_v32 = vpop.f32.mrb[7].mxu0  ;;  %v278_v33 = vadd.f32 %v3981_v27, %v264_v28 }
 0x26f   :  { %v282_v34 = vsel %vm167_vm2, %v278_v33, -inf }
 0x270   :  { %283 = vmax.xlane.f32.xlu1 %v282_v34 }
 0x281   :  { %303 = vrot.lane.b32.xlu1 %v3958_v11, %s3800_s22 }
 0x285   :  { %352 = vrot.lane.b32.xlu1 %v3962_v14, %s3800_s22 }
 0x289   :  { %403 = vrot.lane.b32.xlu1 %v3958_v11, %s3801_s29 }
 0x2f9   :  { %v281_v35 = vpop.xlane.xlu1 %280 }
 0x2fa   :  { %v285_v36 = vsub.f32 %v277_v25, %v281_v35 }
 0x2fc   :  { %v287_v37 = vmul.f32 1.442695, %v285_v36 }
 0x2fd   :  { %v284_v38 = vpop.xlane.xlu1 %283 }
 0x2fe   :  { %3612 = vpow2.f32 %v287_v37  ;;  %v286_v39 = vsub.f32 %v278_v33, %v284_v38 }
 0x300   :  { %v289_v40 = vmul.f32 1.442695, %v286_v39 }
 0x301   :  { %v304_v41 = vpop.permute.xlu1 %303 }
 0x302   :  { %3614 = vpow2.f32 %v289_v40  ;;  %v310_v42 = vsel %vm308_vm3, %v304_v41, 0 }
 0x303   :  { %3289 = vmatpush3.bf16.msra.mxu1 %v310_v42 }
 0x304   :  { %3300 = vmatprep.subr.bf16.mxu1 %v3797_v0 }
 0x305   :  { %v353_v43 = vpop.permute.xlu1 %352 }
 0x306   :  { %v358_v44 = vsel %vm308_vm3, %v353_v43, 0 }
 0x307   :  { %3295 = vmatpush3.bf16.msra.mxu0 %v358_v44 }
 0x308   :  { %v3613_v45 = vpop.eup %3612  ;;  %3306 = vmatprep.subr.bf16.mxu0 %v3797_v0 }
 0x309   :  { %v291_v46 = vsel %vm167_vm2, %v3613_v45, 0.0  ;;  %v404_v49 = vpop.permute.xlu1 %403 }
 0x30a   :  { %292 = vadd.xlane.f32.xlu0 %v291_v46  ;;  %v409_v56 = vsel %vm167_vm2, %v404_v49, 0  ;;  %v90_v46 = vld [vmem:[%s4561_s5 + $0x4] sm:$0xf] }
 0x30b   :  { %v630_v49 = vsel %vm308_vm3, %v90_v46, 0 }
 0x30c   :  { %v3615_v47 = vpop.eup %3614 }
 0x30d   :  { %v294_v48 = vsel %vm167_vm2, %v3615_v47, 0.0 }
 0x30e   :  { %295 = vadd.xlane.f32.xlu1 %v294_v48 }
 0x31f   :  { %453 = vrot.lane.b32.xlu1 %v3962_v14, %s3801_s29 }
 0x320   :  { %401 = vrot.lane.b32.xlu0 %v3958_v11, %s3802_s30 }
 0x323   :  { %451 = vrot.lane.b32.xlu1 %v3962_v14, %s3802_s30 }
 0x397   :  { %v293_v50 = vpop.xlane.xlu0 %292 }
 0x398   :  { %3616 = vrcp.f32 %v293_v50 }
 0x39b   :  { %v296_v51 = vpop.xlane.xlu1 %295  ;;  %v402_v61 = vpop.permute.xlu0 %401 }
 0x39c   :  { %3618 = vrcp.f32 %v296_v51  ;;  %v89_v51 = vld [vmem:[%s4561_s5] sm:$0xf] }
 0x39f   :  { %v454_v58 = vpop.permute.xlu1 %453 }
 0x3a0   :  { %v459_v60 = vsel %vm167_vm2, %v454_v58, 0 }
 0x3a2   :  { %v3617_v52 = vpop.eup %3616 }
 0x3a3   :  { %v299_v53 = vmul.f32 %v3617_v52, %v3613_v45  ;;  %v452_v62 = vpop.permute.xlu1 %451 }
 0x3a5   :  { %v301_v54 = vpack.c.bf16 %v299_v53, %v299_v53 }
 0x3a6   :  { %v3619_v55 = vpop.eup %3618 }
 0x3a7   :  { %v300_v57 = vmul.f32 %v3619_v55, %v3615_v47  ;;  %3291 = vmatmul.mubr.msk.bf16.vlgmr.msra.gmra.mrb[4].mxu1 %vm167_vm2, %v301_v54  ;;  %v677_v54 = vsel %vm308_vm3, %v89_v51, 0 }
 0x3a8   :  { %3301 = vmatpush3.bf16.xpose.msra.mxu1 %v409_v56  ;;  %3302 = vmatprep.mubr.msk.bf16.mxu1 %vm3798_vm0, %v3797_v0 }
 0x3a9   :  { %v302_v59 = vpack.c.bf16 %v300_v57, %v300_v57  ;;  %3312 = vmatprep.subr.bf16.mxu1 %v3797_v0 }
 0x3ab   :  { %3297 = vmatmul.mubr.msk.bf16.vlgmr.msra.gmra.mrb[8].mxu0 %vm167_vm2, %v302_v59 }
 0x3ac   :  { %3307 = vmatpush3.bf16.xpose.msra.mxu0 %v459_v60  ;;  %3308 = vmatprep.mubr.msk.bf16.mxu0 %vm3798_vm0, %v3797_v0 }
 0x3ad   :  { %3318 = vmatprep.subr.bf16.mxu0 %v3797_v0 }
 0x3af   :  { %3303 = vmatmul.mubr.msk.bf16.vlgmr.msra.gmra.mrb[8].mxu1 %vm167_vm2, %v402_v61 }
 0x3b0   :  { %3314 = vmatprep.mubr.msk.bf16.mxu1 %vm3798_vm0, %v3797_v0 }
 0x3b3   :  { %3309 = vmatmul.mubr.msk.bf16.vlgmr.msra.gmra.mrb[12].mxu0 %vm167_vm2, %v452_v62 }
 0x3b4   :  { %3320 = vmatprep.mubr.msk.bf16.mxu0 %vm3798_vm0, %v3797_v0 }
 0x47a   :  { %v4020_v63 = vpop.f32.mrb[4].mxu1 }
 0x47b   :  { %v3292_v1 = vpop.f32.mrb[5].mxu1 }
 0x47c   :  { %v349_v2 = vpop.f32.mrb[6].mxu1 }
 0x47d   :  { %v3293_v5 = vpop.f32.mrb[7].mxu1 }
 0x47e   :  { %v4022_v6 = vpop.f32.mrb[8].mxu0 }
 0x47f   :  { %v400_v7 = vpack.c.bf16 %v4022_v6, %v4020_v63  ;;  %v3298_v8 = vpop.f32.mrb[9].mxu0 }
 0x480   :  { %v397_v9 = vpop.f32.mrb[10].mxu0 }
 0x481   :  { %v3299_v10 = vpop.f32.mrb[11].mxu0 }
 0x482   :  { %v445_v12 = vpop.f32.mrb[8].mxu1 }
 0x483   :  { %v501_v13 = vmul.f32 0.35355338, %v445_v12  ;;  %v3304_v15 = vpop.f32.mrb[9].mxu1 }
 0x484   :  { %v448_v16 = vpop.f32.mrb[10].mxu1 }
 0x485   :  { %v3305_v17 = vpop.f32.mrb[11].mxu1  ;;  %v503_v18 = vadd.f32 %v3978_v20, %v501_v13 }
 0x486   :  { %v495_v19 = vpop.f32.mrb[12].mxu0 }
 0x487   :  { %v502_v21 = vmul.f32 0.35355338, %v495_v19  ;;  %v3310_v22 = vpop.f32.mrb[13].mxu0  ;;  %v505_v23 = vsel %vm167_vm2, %v503_v18, -inf }
 0x488   :  { %506 = vmax.xlane.f32.xlu1 %v505_v23  ;;  %v498_v24 = vpop.f32.mrb[14].mxu0 }
 0x489   :  { %v3311_v25 = vpop.f32.mrb[15].mxu0  ;;  %v504_v26 = vadd.f32 %v3981_v27, %v502_v21 }
 0x48b   :  { %v508_v28 = vsel %vm167_vm2, %v504_v26, -inf }
 0x48c   :  { %509 = vmax.xlane.f32.xlu0 %v508_v28 }
 0x4a2   :  { %577 = vrot.lane.b32.xlu0 %v3962_v14, %s3803_s13 }
 0x4a6   :  { %720 = vrot.lane.b32.xlu0 %v3958_v11, %s3804_s14 }
 0x515   :  { %v507_v29 = vpop.xlane.xlu1 %506 }
 0x516   :  { %v511_v30 = vsub.f32 %v503_v18, %v507_v29 }
 0x518   :  { %v513_v31 = vmul.f32 1.442695, %v511_v30 }
 0x519   :  { %v510_v32 = vpop.xlane.xlu0 %509 }
 0x51a   :  { %3620 = vpow2.f32 %v513_v31  ;;  %v512_v33 = vsub.f32 %v504_v26, %v510_v32 }
 0x51c   :  { %v515_v34 = vmul.f32 1.442695, %v512_v33 }
 0x51d   :  { %v578_v35 = vpop.permute.xlu0 %577 }
 0x51e   :  { %3622 = vpow2.f32 %v515_v34  ;;  %v583_v36 = vsel %vm308_vm3, %v578_v35, 0 }
 0x51f   :  { %3319 = vmatpush3.bf16.msra.mxu0 %v583_v36 }
 0x520   :  { %3330 = vmatprep.subr.bf16.mxu0 %v3797_v0 }
 0x521   :  { %v721_v10 = vpop.permute.xlu0 %720 }
 0x524   :  { %v3621_v37 = vpop.eup %3620 }
 0x525   :  { %v517_v38 = vsel %vm167_vm2, %v3621_v37, 0.0 }
 0x526   :  { %518 = vadd.xlane.f32.xlu1 %v517_v38 }
 0x528   :  { %v3623_v39 = vpop.eup %3622 }
 0x529   :  { %v520_v40 = vsel %vm167_vm2, %v3623_v39, 0.0 }
 0x52a   :  { %521 = vadd.xlane.f32.xlu1 %v520_v40 }
 0x53b   :  { %529 = vrot.lane.b32.xlu1 %v3958_v11, %s3803_s13 }
 0x53f   :  { %722 = vrot.lane.b32.xlu1 %v3958_v11, %s3805_s17 }
 0x543   :  { %772 = vrot.lane.b32.xlu1 %v3962_v14, %s3805_s17 }
 0x547   :  { %770 = vrot.lane.b32.xlu1 %v3962_v14, %s3804_s14 }
 0x5b3   :  { %v519_v41 = vpop.xlane.xlu1 %518 }
 0x5b4   :  { %3624 = vrcp.f32 %v519_v41 }
 0x5b7   :  { %v522_v42 = vpop.xlane.xlu1 %521 }
 0x5b8   :  { %3626 = vrcp.f32 %v522_v42 }
 0x5bb   :  { %v530_v43 = vpop.permute.xlu1 %529 }
 0x5bc   :  { %v535_v44 = vsel %vm308_vm3, %v530_v43, 0 }
 0x5bd   :  { %3313 = vmatpush3.bf16.msra.mxu1 %v535_v44 }
 0x5be   :  { %v3625_v45 = vpop.eup %3624  ;;  %3324 = vmatprep.subr.bf16.mxu1 %v3797_v0 }
 0x5bf   :  { %v525_v47 = vmul.f32 %v3625_v45, %v3621_v37  ;;  %v723_v55 = vpop.permute.xlu1 %722 }
 0x5c0   :  { %v728_v6 = vsel %vm167_vm2, %v723_v55, 0 }
 0x5c1   :  { %v527_v48 = vpack.c.bf16 %v525_v47, %v525_v47 }
 0x5c2   :  { %v3627_v50 = vpop.eup %3626 }
 0x5c3   :  { %v526_v52 = vmul.f32 %v3627_v50, %v3623_v39  ;;  %3315 = vmatmul.mubr.msk.bf16.vlgmr.msra.gmra.mrb[12].mxu1 %vm167_vm2, %v527_v48  ;;  %v773_v56 = vpop.permute.xlu1 %772 }
 0x5c4   :  { %3325 = vmatpush3.bf16.msra.mxu1 %v630_v49  ;;  %3326 = vmatprep.mubr.msk.bf16.mxu1 %vm3798_vm0, %v3797_v0  ;;  %v778_v57 = vsel %vm167_vm2, %v773_v56, 0 }
 0x5c5   :  { %v528_v53 = vpack.c.bf16 %v526_v52, %v526_v52  ;;  %3336 = vmatprep.subr.bf16.mxu1 %v3797_v0 }
 0x5c7   :  { %3321 = vmatmul.mubr.msk.bf16.vlgmr.msra.gmra.mrb[16].mxu0 %vm167_vm2, %v528_v53  ;;  %v771_v58 = vpop.permute.xlu1 %770 }
 0x5c8   :  { %3331 = vmatpush3.bf16.msra.mxu0 %v677_v54  ;;  %3332 = vmatprep.mubr.msk.bf16.mxu0 %vm3798_vm0, %v3797_v0 }
 0x5c9   :  { %3342 = vmatprep.subr.bf16.mxu0 %v3797_v0 }
 0x5cf   :  { %3333 = vmatmul.mubr.msk.bf16.vlgmr.msra.gmra.mrb[20].mxu0 %vm167_vm2, %v400_v7 }
 0x5d0   :  { %3344 = vmatprep.mubr.msk.bf16.mxu0 %vm3798_vm0, %v3797_v0 }
 0x5d1   :  { %3343 = vmatpush3.bf16.xpose.msra.mxu0 %v778_v57 }
 0x5d2   :  { %3354 = vmatprep.subr.bf16.mxu0 %v3797_v0 }
 0x5d8   :  { %3345 = vmatmul.mubr.msk.bf16.vlgmr.msra.gmra.mrb[24].mxu0 %vm167_vm2, %v771_v58 }
 0x5d9   :  { %3356 = vmatprep.mubr.msk.bf16.mxu0 %vm3798_vm0, %v3797_v0 }
 0x696   :  { %v571_v59 = vpop.f32.mrb[12].mxu1 }
 0x697   :  { %v3316_v60 = vpop.f32.mrb[13].mxu1 }
 0x698   :  { %v574_v61 = vpop.f32.mrb[14].mxu1 }
 0x699   :  { %v3317_v62 = vpop.f32.mrb[15].mxu1 }
 0x69a   :  { %v619_v63 = vpop.f32.mrb[16].mxu0  ;;  %v91_v62 = vld [vmem:[%s4561_s5 + $0x8] sm:$0xf] }
 0x69b   :  { %v625_v1 = vpack.c.bf16 %v619_v63, %v571_v59  ;;  %v3322_v2 = vpop.f32.mrb[17].mxu0  ;;  %v949_v63 = vsel %vm308_vm3, %v91_v62, 0 }
 0x69c   :  { %v622_v5 = vpop.f32.mrb[18].mxu0 }
 0x69d   :  { %v3323_v7 = vpop.f32.mrb[19].mxu0  ;;  %3327 = vmatmul.mubr.msk.bf16.vlgmr.msra.gmra.mrb[16].mxu1 %vm167_vm2, %v625_v1 }
 0x69e   :  { %3337 = vmatpush3.bf16.xpose.msra.mxu1 %v728_v6  ;;  %3338 = vmatprep.mubr.msk.bf16.mxu1 %vm3798_vm0, %v3797_v0 }
 0x69f   :  { %3348 = vmatprep.subr.bf16.mxu1 %v3797_v0 }
 0x6a2   :  { %v713_v8 = vpop.f32.mrb[20].mxu0 }
 0x6a3   :  { %v3334_v9 = vpop.f32.mrb[21].mxu0 }
 0x6a4   :  { %v716_v12 = vpop.f32.mrb[22].mxu0 }
 0x6a5   :  { %v3335_v13 = vpop.f32.mrb[23].mxu0  ;;  %3339 = vmatmul.mubr.msk.bf16.vlgmr.msra.gmra.mrb[20].mxu1 %vm167_vm2, %v721_v10 }
 0x6a6   :  { %3350 = vmatprep.mubr.msk.bf16.mxu1 %vm3798_vm0, %v3797_v0 }
 0x6ab   :  { %v814_v15 = vpop.f32.mrb[24].mxu0 }
 0x6ac   :  { %v821_v16 = vmul.f32 0.35355338, %v814_v15  ;;  %v3346_v17 = vpop.f32.mrb[25].mxu0 }
 0x6ad   :  { %v817_v18 = vpop.f32.mrb[26].mxu0 }
 0x6ae   :  { %v3347_v19 = vpop.f32.mrb[27].mxu0  ;;  %v823_v21 = vadd.f32 %v3981_v27, %v821_v16 }
 0x6b0   :  { %v827_v22 = vsel %vm167_vm2, %v823_v21, -inf }
 0x6b1   :  { %828 = vmax.xlane.f32.xlu1 %v827_v22 }
 0x6c2   :  { %848 = vrot.lane.b32.xlu1 %v3958_v11, %s3806_s23 }
 0x6c6   :  { %996 = vrot.lane.b32.xlu1 %v3958_v11, %s3807_s1 }
 0x6ca   :  { %1046 = vrot.lane.b32.xlu1 %v3962_v14, %s3807_s1 }
 0x6ce   :  { %1044 = vrot.lane.b32.xlu1 %v3962_v14, %s3808_s24 }
 0x73e   :  { %v829_v23 = vpop.xlane.xlu1 %828 }
 0x73f   :  { %v831_v26 = vsub.f32 %v823_v21, %v829_v23 }
 0x741   :  { %v834_v28 = vmul.f32 1.442695, %v831_v26 }
 0x742   :  { %v849_v24 = vpop.permute.xlu1 %848 }
 0x743   :  { %v854_v25 = vsel %vm308_vm3, %v849_v24, 0  ;;  %3628 = vpow2.f32 %v834_v28 }
 0x744   :  { %3349 = vmatpush3.bf16.msra.mxu1 %v854_v25 }
 0x745   :  { %3360 = vmatprep.subr.bf16.mxu1 %v3797_v0 }
 0x746   :  { %v997_v57 = vpop.permute.xlu1 %996 }
 0x747   :  { %v1002_v59 = vsel %vm167_vm2, %v997_v57, 0 }
 0x74a   :  { %v1047_v7 = vpop.permute.xlu1 %1046 }
 0x74b   :  { %v1052_v13 = vsel %vm167_vm2, %v1047_v7, 0  ;;  %v1268_v7 = vlaneseq }
 0x74d   :  { %v3629_v42 = vpop.eup %3628 }
 0x74e   :  { %v839_v43 = vsel %vm167_vm2, %v3629_v42, 0.0  ;;  %v1045_v23 = vpop.permute.xlu1 %1044 }
 0x770   :  { %v666_v29 = vpop.f32.mrb[16].mxu1 }
 0x771   :  { %v4095_v30 = vadd.f32 %v713_v8, %v666_v29  ;;  %v3328_v31 = vpop.f32.mrb[17].mxu1 }
 0x772   :  { %v669_v32 = vpop.f32.mrb[18].mxu1 }
 0x773   :  { %v4097_v33 = vadd.f32 %v716_v12, %v669_v32  ;;  %v3329_v34 = vpop.f32.mrb[19].mxu1 }
 0x778   :  { %v764_v35 = vpop.f32.mrb[20].mxu1 }
 0x779   :  { %v820_v36 = vmul.f32 0.35355338, %v764_v35  ;;  %v3340_v37 = vpop.f32.mrb[21].mxu1 }
 0x77a   :  { %v767_v38 = vpop.f32.mrb[22].mxu1 }
 0x77b   :  { %v3341_v39 = vpop.f32.mrb[23].mxu1  ;;  %v822_v40 = vadd.f32 %v3978_v20, %v820_v36 }
 0x77d   :  { %v824_v41 = vsel %vm167_vm2, %v822_v40, -inf }
 0x77e   :  { %825 = vmax.xlane.f32.xlu0 %v824_v41 }
 0x782   :  { %840 = vadd.xlane.f32.xlu0 %v839_v43 }
 0x80b   :  { %v826_v44 = vpop.xlane.xlu0 %825 }
 0x80c   :  { %v830_v45 = vsub.f32 %v822_v40, %v826_v44 }
 0x80e   :  { %v832_v46 = vmul.f32 1.442695, %v830_v45 }
 0x80f   :  { %v841_v49 = vpop.xlane.xlu0 %840 }
 0x810   :  { %3630 = vpow2.f32 %v832_v46 }
 0x811   :  { %3632 = vrcp.f32 %v841_v49 }
 0x81a   :  { %v3631_v47 = vpop.eup %3630 }
 0x81b   :  { %v836_v48 = vsel %vm167_vm2, %v3631_v47, 0.0  ;;  %v3633_v50 = vpop.eup %3632 }
 0x81c   :  { %837 = vadd.xlane.f32.xlu0 %v836_v48  ;;  %v845_v52 = vmul.f32 %v3633_v50, %v3629_v42 }
 0x81e   :  { %v847_v55 = vpack.c.bf16 %v845_v52, %v845_v52  ;;  %v92_v52 = vld [vmem:[%s4561_s5 + $0xc] sm:$0xf] }
 0x832   :  { %896 = vrot.lane.b32.xlu0 %v3962_v14, %s3806_s23 }
 0x836   :  { %994 = vrot.lane.b32.xlu0 %v3958_v11, %s3808_s24 }
 0x8a9   :  { %v838_v51 = vpop.xlane.xlu0 %837 }
 0x8aa   :  { %3634 = vrcp.f32 %v838_v51 }
 0x8ad   :  { %v897_v53 = vpop.permute.xlu0 %896 }
 0x8ae   :  { %v902_v54 = vsel %vm308_vm3, %v897_v53, 0  ;;  %v1223_v53 = vsel %vm308_vm3, %v92_v52, 0 }
 0x8af   :  { %3355 = vmatpush3.bf16.msra.mxu0 %v902_v54 }
 0x8b0   :  { %3366 = vmatprep.subr.bf16.mxu0 %v3797_v0 }
 0x8b1   :  { %v995_v61 = vpop.permute.xlu0 %994 }
 0x8b2   :  { %3357 = vmatmul.mubr.msk.bf16.vlgmr.msra.gmra.mrb[28].mxu0 %vm167_vm2, %v847_v55 }
 0x8b3   :  { %3368 = vmatprep.mubr.msk.bf16.mxu0 %vm3798_vm0, %v3797_v0 }
 0x8b4   :  { %v3635_v56 = vpop.eup %3634 }
 0x8b5   :  { %v844_v58 = vmul.f32 %v3635_v56, %v3631_v47 }
 0x8b7   :  { %v846_v60 = vpack.c.bf16 %v844_v58, %v844_v58 }
 0x8b8   :  { %3367 = vmatpush3.bf16.xpose.msra.mxu0 %v1002_v59 }
 0x8b9   :  { %3351 = vmatmul.mubr.msk.bf16.vlgmr.msra.gmra.mrb[24].mxu1 %vm167_vm2, %v846_v60  ;;  %3378 = vmatprep.subr.bf16.mxu0 %v3797_v0 }
 0x8ba   :  { %3362 = vmatprep.mubr.msk.bf16.mxu1 %vm3798_vm0, %v3797_v0  ;;  %3361 = vmatpush3.bf16.msra.mxu1 %v949_v63 }
 0x8bb   :  { %3372 = vmatprep.subr.bf16.mxu1 %v3797_v0 }
 0x8bf   :  { %3369 = vmatmul.mubr.msk.bf16.vlgmr.msra.gmra.mrb[32].mxu0 %vm167_vm2, %v995_v61 }
 0x8c0   :  { %3380 = vmatprep.mubr.msk.bf16.mxu0 %vm3798_vm0, %v3797_v0 }
 0x985   :  { %v938_v1 = vpop.f32.mrb[28].mxu0 }
 0x986   :  { %v3358_v2 = vpop.f32.mrb[29].mxu0 }
 0x987   :  { %v941_v5 = vpop.f32.mrb[30].mxu0 }
 0x988   :  { %v3359_v6 = vpop.f32.mrb[31].mxu0 }
 0x98c   :  { %v890_v8 = vpop.f32.mrb[24].mxu1 }
 0x98d   :  { %v944_v9 = vpack.c.bf16 %v938_v1, %v890_v8  ;;  %v3352_v10 = vpop.f32.mrb[25].mxu1  ;;  %v4167_v8 = vshrl.u32 %v1268_v7, 7 }
 0x98e   :  { %v893_v12 = vpop.f32.mrb[26].mxu1  ;;  %v4173_v10 = vld [vmem:[%s4565_s9] sm:$0x3f] }
 0x98f   :  { %v3353_v15 = vpop.f32.mrb[27].mxu1  ;;  %3363 = vmatmul.mubr.msk.bf16.vlgmr.msra.gmra.mrb[28].mxu1 %vm167_vm2, %v944_v9  ;;  %v1270_v9 = vsub.s32 0, %v4167_v8 }
 0x990   :  { %3373 = vmatpush3.bf16.xpose.msra.mxu1 %v1052_v13  ;;  %3374 = vmatprep.mubr.msk.bf16.mxu1 %vm3798_vm0, %v3797_v0 }
 0x991   :  { %3384 = vmatprep.subr.bf16.mxu1 %v3797_v0  ;;  %v1271_v12 = vrot.slane %v4173_v10, %v1270_v9 }
 0x992   :  { %v1038_v16 = vpop.f32.mrb[32].mxu0 }
 0x993   :  { %v1094_v17 = vmul.f32 0.35355338, %v1038_v16  ;;  %v3370_v18 = vpop.f32.mrb[33].mxu0 }
 0x994   :  { %v1041_v19 = vpop.f32.mrb[34].mxu0 }
 0x995   :  { %v3371_v21 = vpop.f32.mrb[35].mxu0  ;;  %v1096_v22 = vadd.f32 %v3978_v20, %v1094_v17 }
 0x997   :  { %3375 = vmatmul.mubr.msk.bf16.vlgmr.msra.gmra.mrb[32].mxu1 %vm167_vm2, %v1045_v23  ;;  %v1098_v24 = vsel %vm167_vm2, %v1096_v22, -inf }
 0x998   :  { %1099 = vmax.xlane.f32.xlu0 %v1098_v24  ;;  %3386 = vmatprep.mubr.msk.bf16.mxu1 %vm3798_vm0, %v3797_v0 }
 0xa25   :  { %v1100_v25 = vpop.xlane.xlu0 %1099 }
 0xa26   :  { %v1104_v26 = vsub.f32 %v1096_v22, %v1100_v25 }
 0xa28   :  { %v1106_v28 = vmul.f32 1.442695, %v1104_v26 }
 0xa2a   :  { %3636 = vpow2.f32 %v1106_v28 }
 0xa34   :  { %v3637_v29 = vpop.eup %3636 }
 0xa35   :  { %v1110_v31 = vsel %vm167_vm2, %v3637_v29, 0.0 }
 0xa36   :  { %1111 = vadd.xlane.f32.xlu0 %v1110_v31 }
 0xa62   :  { %v985_v32 = vpop.f32.mrb[28].mxu1 }
 0xa63   :  { %v4137_v20 = vadd.f32 %v985_v32, %v4095_v30  ;;  %v3364_v34 = vpop.f32.mrb[29].mxu1 }
 0xa64   :  { %v988_v35 = vpop.f32.mrb[30].mxu1 }
 0xa65   :  { %v4140_v36 = vadd.f32 %v988_v35, %v4097_v33  ;;  %v3365_v37 = vpop.f32.mrb[31].mxu1 }
 0xa6a   :  { %v1088_v38 = vpop.f32.mrb[32].mxu1 }
 0xa6b   :  { %v1095_v39 = vmul.f32 0.35355338, %v1088_v38  ;;  %v3376_v40 = vpop.f32.mrb[33].mxu1  ;;  %v3597_v38 = vld [vmem:[%s4562_s6 + $0x8] sm:$0xff]  }
 0xa6c   :  { %v1091_v41 = vpop.f32.mrb[34].mxu1  ;;  %v3599_v40 = vld [vmem:[%s4564_s8 + $0x8] sm:$0xff]  }
 0xa6d   :  { %v3377_v42 = vpop.f32.mrb[35].mxu1  ;;  %v1097_v43 = vadd.f32 %v3981_v27, %v1095_v39  ;;  %v3598_v39 = vld [vmem:[%s4564_s8] sm:$0xff]  }
 0xa6f   :  { %v1101_v44 = vsel %vm167_vm2, %v1097_v43, -inf }
 0xa70   :  { %1102 = vmax.xlane.f32.xlu1 %v1101_v44 }
 0xa81   :  { %1122 = vrot.lane.b32.xlu1 %v3958_v11, %s3809_s7 }
 0xac3   :  { %v1112_v30 = vpop.xlane.xlu0 %1111 }
 0xac4   :  { %3638 = vrcp.f32 %v1112_v30 }
 0xace   :  { %v3639_v45 = vpop.eup %3638 }
 0xacf   :  { %v1118_v47 = vmul.f32 %v3639_v45, %v3637_v29 }
 0xad1   :  { %v1120_v27 = vpack.c.bf16 %v1118_v47, %v1118_v47  ;;  %v1311_v47 = vsub.s32 3, %v4167_v8 }
 0xafd   :  { %v1103_v33 = vpop.xlane.xlu1 %1102 }
 0xafe   :  { %v1105_v46 = vsub.f32 %v1097_v43, %v1103_v33  ;;  %v1305_v33 = vsub.s32 2, %v4167_v8 }
 0xb00   :  { %v1108_v48 = vmul.f32 1.442695, %v1105_v46  ;;  %v1306_v46 = vrot.slane %v4173_v10, %v1305_v33 }
 0xb01   :  { %v1123_v49 = vpop.permute.xlu1 %1122 }
 0xb02   :  { %3640 = vpow2.f32 %v1108_v48  ;;  %v1128_v50 = vsel %vm308_vm3, %v1123_v49, 0 }
 0xb03   :  { %3379 = vmatpush3.bf16.msra.mxu0 %v1128_v50 }
 0xb04   :  { %3390 = vmatprep.subr.bf16.mxu0 %v3797_v0 }
 0xb06   :  { %3381 = vmatmul.mubr.msk.bf16.vlgmr.msra.gmra.mrb[36].mxu0 %vm167_vm2, %v1120_v27 }
 0xb07   :  { %3392 = vmatprep.mubr.msk.bf16.mxu0 %vm3798_vm0, %v3797_v0  ;;  %3391 = vmatpush3.bf16.msra.mxu0 %v1223_v53 }
 0xb08   :  { %3404 = vmatprep.subr.bf16.mxu0 %v3797_v0 }
 0xb0c   :  { %v3641_v11 = vpop.eup %3640 }
 0xb0d   :  { %v1113_v51 = vsel %vm167_vm2, %v3641_v11, 0.0 }
 0xb0e   :  { %1114 = vadd.xlane.f32.xlu0 %v1113_v51  ;;  %v1312_v51 = vrot.slane %v4173_v10, %v1311_v47 }
 0xb24   :  { %1170 = vrot.lane.b32.xlu0 %v3962_v14, %s3809_s7 }
 0xb9b   :  { %v1115_v54 = vpop.xlane.xlu0 %1114 }
 0xb9c   :  { %3642 = vrcp.f32 %v1115_v54 }
 0xb9f   :  { %v1171_v55 = vpop.permute.xlu0 %1170 }
 0xba0   :  { %v1176_v56 = vsel %vm308_vm3, %v1171_v55, 0 }
 0xba1   :  { %3385 = vmatpush3.bf16.msra.mxu1 %v1176_v56  ;;  %v3600_v56 = vld [vmem:[%s4564_s8 + $0x10] sm:$0xff]  }
 0xba2   :  { %3396 = vmatprep.subr.bf16.mxu1 %v3797_v0 }
 0xba6   :  { %v3643_v57 = vpop.eup %3642 }
 0xba7   :  { %v1119_v58 = vmul.f32 %v3643_v57, %v3641_v11  ;;  %v3601_v57 = vld [vmem:[%s4564_s8 + $0x18] sm:$0xff]  }
 0xba9   :  { %v1121_v14 = vpack.c.bf16 %v1119_v58, %v1119_v58  ;;  %v3096_v58 = vld [vmem:[#allocation7] ss:$0 sm:$0xff] }
 0xbab   :  { %3387 = vmatmul.mubr.msk.bf16.vlgmr.msra.gmra.mrb[36].mxu1 %vm167_vm2, %v1121_v14 }
 0xbac   :  { %3400 = vmatprep.mubr.msk.bf16.mxu1 %vm3798_vm0, %v3797_v0 }
 0xbd9   :  { %v1164_v59 = vpop.f32.mrb[36].mxu0 }
 0xbda   :  { %v3382_v60 = vpop.f32.mrb[37].mxu0 }
 0xbdb   :  { %v1167_v61 = vpop.f32.mrb[38].mxu0 }
 0xbdc   :  { %v3383_v62 = vpop.f32.mrb[39].mxu0 }
 0xc7e   :  { %v1212_v63 = vpop.f32.mrb[36].mxu1 }
 0xc7f   :  { %v1218_v1 = vpack.c.bf16 %v1212_v63, %v1164_v59  ;;  %v3388_v2 = vpop.f32.mrb[37].mxu1 }
 0xc80   :  { %v1215_v5 = vpop.f32.mrb[38].mxu1 }
 0xc81   :  { %v3389_v6 = vpop.f32.mrb[39].mxu1  ;;  %3393 = vmatmul.mubr.msk.bf16.vlgmr.msra.gmra.mrb[40].mxu0 %vm167_vm2, %v1218_v1 }
 0xc82   :  { %3412 = vmatprep.mubr.msk.bf16.mxu0 %vm3798_vm0, %v3797_v0  ;;  %3405 = vmatpush3.bf16.msra.mxu0 %v3598_v39  ;;  %v1396_v6 = vsub.s32 1, %v4167_v8 }
 0xc83   :  { %3406 = vmatprep.subr.bf16.mxu0 %v3797_v0 }
 0xc84   :  { %v1397_v7 = vrot.slane %v4173_v10, %v1396_v6 }
 0xc86   :  { %3407 = vmatpush3.bf16.msra.mxu0 %v3599_v40 }
 0xc87   :  { %3408 = vmatprep.subr.bf16.mxu0 %v3797_v0 }
 0xc8a   :  { %3409 = vmatpush3.bf16.msra.mxu0 %v3600_v56 }
 0xc8b   :  { %3410 = vmatprep.subr.bf16.mxu0 %v3797_v0 }
 0xc8e   :  { %3411 = vmatpush3.bf16.msra.mxu0 %v3601_v57 }
 0xc8f   :  { %3430 = vmatprep.subr.bf16.mxu0 %v3797_v0 }
 0xd54   :  { %v1259_v13 = vpop.f32.mrb[40].mxu0 }
 0xd55   :  { %v1266_v15 = vadd.f32 %v1259_v13, %v4137_v20  ;;  %v3394_v16 = vpop.f32.mrb[41].mxu0 }
 0xd56   :  { %v1262_v17 = vpop.f32.mrb[42].mxu0 }
 0xd57   :  { %v1272_v18 = vadd.f32 %v1271_v12, %v1266_v15  ;;  %v1267_v19 = vadd.f32 %v1262_v17, %v4140_v36  ;;  %v3395_v21 = vpop.f32.mrb[43].mxu0 }
 0xd59   :  { %v1273_v22 = vadd.f32 %v1271_v12, %v1267_v19  ;;  %v1274_v23 = vadd.f32 %v1272_v18, %v3944_v3 }
 0xd5b   :  { %v1276_v24 = vsel %vm117_vm1, %v1274_v23, 0.0  ;;  %v1275_v25 = vadd.f32 %v1273_v22, %v3949_v4  ;;  %v3596_v4 = vld [vmem:[%s4562_s6] sm:$0xff]  }
 0xd5c   :  { %1277 = vadd.xlane.f32.xlu1 %v1276_v24  ;;  %3397 = vmatpush3.bf16.msra.mxu1 %v3596_v4 }
 0xd5d   :  { %v1279_v26 = vsel %vm117_vm1, %v1275_v25, 0.0  ;;  %3398 = vmatprep.subr.bf16.mxu1 %v3797_v0 }
 0xd5e   :  { %1280 = vadd.xlane.f32.xlu0 %v1279_v26 }
 0xd60   :  { %3399 = vmatpush3.bf16.msra.mxu1 %v3597_v38 }
 0xd61   :  { %3416 = vmatprep.subr.bf16.mxu1 %v3797_v0 }
 0xde9   :  { %v1278_v28 = vpop.xlane.xlu1 %1277 }
 0xdea   :  { %v1283_v29 = vmul.f32 0.03125, %v1278_v28 }
 0xdeb   :  { %v1281_v31 = vpop.xlane.xlu0 %1280 }
 0xdec   :  { %v1285_v32 = vsub.f32 %v1274_v23, %v1283_v29  ;;  %v1284_v20 = vmul.f32 0.03125, %v1281_v31 }
 0xdee   :  { %v1286_v34 = vsub.f32 %v1275_v25, %v1284_v20  ;;  %v1287_v35 = vmul.f32 %v1285_v32, %v1285_v32 }
 0xdf0   :  { %v1289_v36 = vsel %vm117_vm1, %v1287_v35, 0.0  ;;  %v1288_v37 = vmul.f32 %v1286_v34, %v1286_v34 }
 0xdf1   :  { %1290 = vadd.xlane.f32.xlu1 %v1289_v36  ;;  %v3602_v36 = vld [vmem:[%s4559_s3 + $0x10] sm:$0xff]  }
 0xdf2   :  { %v1292_v3 = vsel %vm117_vm1, %v1288_v37, 0.0  ;;  %v3603_v37 = vld [vmem:[%s4559_s3 + $0x18] sm:$0xff]  }
 0xdf3   :  { %1293 = vadd.xlane.f32.xlu0 %v1292_v3 }
 0xe7e   :  { %v1291_v41 = vpop.xlane.xlu1 %1290 }
 0xe7f   :  { %v1295_v42 = vmul.f32 0.03125, %v1291_v41 }
 0xe80   :  { %v1294_v43 = vpop.xlane.xlu0 %1293 }
 0xe81   :  { %v1297_v44 = vadd.f32 1e-05, %v1295_v42  ;;  %v1296_v30 = vmul.f32 0.03125, %v1294_v43  ;;  %v1497_v42 = vsub.s32 4, %v4167_v8 }
 0xe83   :  { %3644 = vrsqrt.f32 %v1297_v44  ;;  %v1298_v45 = vadd.f32 1e-05, %v1296_v30  ;;  %v1498_v43 = vrot.slane %v4173_v10, %v1497_v42  ;;  %v1503_v44 = vsub.s32 5, %v4167_v8 }
 0xe85   :  { %3646 = vrsqrt.f32 %v1298_v45 }
 0xe8d   :  { %v3645_v48 = vpop.eup %3644 }
 0xe8e   :  { %v1301_v49 = vmul.f32 %v3645_v48, %v1285_v32 }
 0xe8f   :  { %v3647_v50 = vpop.eup %3646 }
 0xe90   :  { %v1307_v27 = vmul.f32 %v1306_v46, %v1301_v49  ;;  %v1302_v11 = vmul.f32 %v3647_v50, %v1286_v34  ;;  %v1504_v50 = vrot.slane %v4173_v10, %v1503_v44 }
 0xe92   :  { %v1308_v52 = vmul.f32 %v1306_v46, %v1302_v11  ;;  %v1313_v53 = vadd.f32 %v1312_v51, %v1307_v27 }
 0xe94   :  { %v1314_v54 = vadd.f32 %v1312_v51, %v1308_v52 }
 0xe96   :  { %v1315_v55 = vpack.c.bf16 %v1314_v54, %v1313_v53 }
 0xe98   :  { %3401 = vmatmul.mubr.msk.bf16.vlgmr.msra.gmra.mrb[40].mxu1 %vm117_vm1, %v1315_v55 }
 0xe99   :  { %3420 = vmatprep.mubr.msk.bf16.mxu1 %vm3798_vm0, %v3797_v0  ;;  %3417 = vmatpush3.bf16.msra.mxu1 %v3602_v36 }
 0xe9a   :  { %3418 = vmatprep.subr.bf16.mxu1 %v3797_v0 }
 0xe9d   :  { %3419 = vmatpush3.bf16.msra.mxu1 %v3603_v37 }
 0xe9e   :  { %3424 = vmatprep.subr.bf16.mxu1 %v3797_v0 }
 0xf6b   :  { %v1376_v14 = vpop.f32.mrb[40].mxu1 }
 0xf6c   :  { %v1377_v59 = vadd.f32 %v3096_v58, %v1376_v14  ;;  %v3402_v60 = vpop.f32.mrb[41].mxu1 }
 0xf6d   :  { %v1379_v61 = vpop.f32.mrb[42].mxu1 }
 0xf6e   :  { %v1380_v62 = vadd.f32 %v3096_v58, %v1379_v61  ;;  %v3403_v63 = vpop.f32.mrb[43].mxu1  ;;  %v1383_v1 = vmax.f32 %v1377_v59, 0.0 }
 0xf70   :  { %v1384_v2 = vmax.f32 %v1380_v62, 0.0 }
 0xf72   :  { %v1385_v5 = vpack.c.bf16 %v1384_v2, %v1383_v1 }
 0xf74   :  { %3413 = vmatmul.mubr.msk.bf16.vlgmr.msra.gmra.mrb[44].mxu0 %vm1422_vm4, %v1385_v5 }
 0xf75   :  { %3432 = vmatprep.mubr.msk.bf16.mxu0 %vm3798_vm0, %v3797_v0 }
0x1047   :  { %v1460_v12 = vpop.f32.mrb[44].mxu0 }
0x1048   :  { %v1461_v13 = vadd.f32 %v1460_v12, %v1397_v7  ;;  %v3414_v15 = vpop.f32.mrb[45].mxu0 }
0x1049   :  { %v1463_v16 = vpop.f32.mrb[46].mxu0 }
0x104a   :  { %v1464_v17 = vadd.f32 %v1463_v16, %v1397_v7  ;;  %v3415_v18 = vpop.f32.mrb[47].mxu0  ;;  %v1467_v19 = vadd.f32 %v1461_v13, %v1313_v53  ;;  %v3114_v53 = vld [vmem:[#allocation5 + $0x1] ss:$0 sm:$0xff] }
0x104c   :  { %v1469_v21 = vsel %vm117_vm1, %v1467_v19, 0.0  ;;  %v1468_v22 = vadd.f32 %v1464_v17, %v1314_v54  ;;  %v4277_v17 = vld [vmem:[#allocation2] ss:$0 sm:$0xff] }
0x104d   :  { %1470 = vadd.xlane.f32.xlu1 %v1469_v21 }
0x104e   :  { %v1472_v23 = vsel %vm117_vm1, %v1468_v22, 0.0 }
0x104f   :  { %1473 = vadd.xlane.f32.xlu0 %v1472_v23  ;;  %v4281_v23 = vld [vmem:[#allocation2 + $0x1] ss:$0 sm:$0xff] }
0x10da   :  { %v1471_v24 = vpop.xlane.xlu1 %1470 }
0x10db   :  { %v1475_v25 = vmul.f32 0.03125, %v1471_v24 }
0x10dc   :  { %v1474_v26 = vpop.xlane.xlu0 %1473 }
0x10dd   :  { %v1477_v28 = vsub.f32 %v1467_v19, %v1475_v25  ;;  %v1476_v29 = vmul.f32 0.03125, %v1474_v26 }
0x10df   :  { %v1478_v31 = vsub.f32 %v1468_v22, %v1476_v29  ;;  %v1479_v32 = vmul.f32 %v1477_v28, %v1477_v28 }
0x10e1   :  { %v1481_v20 = vsel %vm117_vm1, %v1479_v32, 0.0  ;;  %v1480_v34 = vmul.f32 %v1478_v31, %v1478_v31 }
0x10e2   :  { %1482 = vadd.xlane.f32.xlu1 %v1481_v20 }
0x10e3   :  { %v1484_v35 = vsel %vm117_vm1, %v1480_v34, 0.0 }
0x10e4   :  { %1485 = vadd.xlane.f32.xlu0 %v1484_v35 }
0x116f   :  { %v1483_v3 = vpop.xlane.xlu1 %1482 }
0x1170   :  { %v1487_v4 = vmul.f32 0.03125, %v1483_v3 }
0x1171   :  { %v1486_v38 = vpop.xlane.xlu0 %1485 }
0x1172   :  { %v1489_v39 = vadd.f32 1e-05, %v1487_v4  ;;  %v1488_v40 = vmul.f32 0.03125, %v1486_v38 }
0x1174   :  { %3648 = vrsqrt.f32 %v1489_v39  ;;  %v1490_v41 = vadd.f32 1e-05, %v1488_v40 }
0x1176   :  { %3650 = vrsqrt.f32 %v1490_v41 }
0x117e   :  { %v3649_v30 = vpop.eup %3648 }
0x117f   :  { %v1493_v45 = vmul.f32 %v3649_v30, %v1477_v28 }
0x1180   :  { %v3651_v46 = vpop.eup %3650 }
0x1181   :  { %v1499_v48 = vmul.f32 %v1498_v43, %v1493_v45  ;;  %v1494_v49 = vmul.f32 %v3651_v46, %v1478_v31 }
0x1183   :  { %v1500_v27 = vmul.f32 %v1498_v43, %v1494_v49  ;;  %v4248_v11 = vadd.f32 %v1504_v50, %v1499_v48 }
0x1185   :  { %v4250_v51 = vadd.f32 %v1504_v50, %v1500_v27 }
0x1187   :  { %v1514_v52 = vpack.c.bf16 %v4250_v51, %v4248_v11 }
0x1189   :  { %3421 = vmatmul.mubr.msk.bf16.vlgmr.msra.gmra.mrb[44].mxu1 %vm117_vm1, %v1514_v52 }
0x118a   :  { %3426 = vmatprep.mubr.msk.bf16.mxu1 %vm3798_vm0, %v3797_v0 }
0x125c   :  { %v1577_v54 = vpop.f32.mrb[44].mxu1 }
0x125d   :  { %v1578_v55 = vadd.f32 %v3114_v53, %v1577_v54  ;;  %v3422_v56 = vpop.f32.mrb[45].mxu1 }
0x125e   :  { %v1580_v57 = vpop.f32.mrb[46].mxu1 }
0x125f   :  { %v4257_v58 = vpack.c.bf16 %v1578_v55, %v1578_v55  ;;  %v1581_v10 = vadd.f32 %v3114_v53, %v1580_v57  ;;  %v3423_v14 = vpop.f32.mrb[47].mxu1 }
0x1261   :  { %v4259_v59 = vpack.c.bf16 %v1581_v10, %v1581_v10  ;;  %1587 = vrot.lane.b32.xlu1 %v4257_v58, %s3799_s0 }
0x1263   :  { %1636 = vrot.lane.b32.xlu0 %v4259_v59, %s3799_s0 }
0x12d3   :  { %v1588_v60 = vpop.permute.xlu1 %1587 }
0x12d4   :  { %v1593_v61 = vsel %vm167_vm2, %v1588_v60, 0 }
0x12d5   :  { %3425 = vmatpush3.bf16.xpose.msra.mxu1 %v1593_v61  ;;  %v1637_v62 = vpop.permute.xlu0 %1636 }
0x12d6   :  { %v1642_v63 = vsel %vm167_vm2, %v1637_v62, 0  ;;  %3436 = vmatprep.subr.bf16.mxu1 %v3797_v0 }
0x12d7   :  { %3431 = vmatpush3.bf16.xpose.msra.mxu0 %v1642_v63 }
0x12d8   :  { %3442 = vmatprep.subr.bf16.mxu0 %v3797_v0 }
0x12dc   :  { %3427 = vmatmul.mubr.msk.bf16.vlgmr.msra.gmra.mrb[48].mxu1 %vm167_vm2, %v4257_v58 }
0x12dd   :  { %3438 = vmatprep.mubr.msk.bf16.mxu1 %vm3798_vm0, %v3797_v0 }
0x12de   :  { %3433 = vmatmul.mubr.msk.bf16.vlgmr.msra.gmra.mrb[48].mxu0 %vm167_vm2, %v4259_v59 }
0x12df   :  { %3444 = vmatprep.mubr.msk.bf16.mxu0 %vm3798_vm0, %v3797_v0 }
0x13af   :  { %v1629_v1 = vpop.f32.mrb[48].mxu1 }
0x13b0   :  { %v1684_v2 = vmul.f32 0.35355338, %v1629_v1  ;;  %v3428_v5 = vpop.f32.mrb[49].mxu1 }
0x13b1   :  { %v1632_v7 = vpop.f32.mrb[50].mxu1  ;;  %v1678_v12 = vpop.f32.mrb[48].mxu0 }
0x13b2   :  { %v1685_v13 = vmul.f32 0.35355338, %v1678_v12  ;;  %v3429_v15 = vpop.f32.mrb[51].mxu1  ;;  %v3434_v16 = vpop.f32.mrb[49].mxu0  ;;  %v1686_v18 = vadd.f32 %v4277_v17, %v1684_v2 }
0x13b3   :  { %v1681_v19 = vpop.f32.mrb[50].mxu0 }
0x13b4   :  { %v3435_v21 = vpop.f32.mrb[51].mxu0  ;;  %v1688_v22 = vsel %vm167_vm2, %v1686_v18, -inf  ;;  %v1687_v24 = vadd.f32 %v4281_v23, %v1685_v13 }
0x13b5   :  { %1689 = vmax.xlane.f32.xlu1 %v1688_v22 }
0x13b6   :  { %v1691_v25 = vsel %vm167_vm2, %v1687_v24, -inf }
0x13b7   :  { %1692 = vmax.xlane.f32.xlu0 %v1691_v25 }
0x13c6   :  { %1712 = vrot.lane.b32.xlu1 %v4257_v58, %s3800_s22 }
0x1442   :  { %v1690_v26 = vpop.xlane.xlu1 %1689 }
0x1443   :  { %v1694_v28 = vsub.f32 %v1686_v18, %v1690_v26 }
0x1444   :  { %v1693_v29 = vpop.xlane.xlu0 %1692 }
0x1445   :  { %v1696_v31 = vmul.f32 1.442695, %v1694_v28  ;;  %v1695_v32 = vsub.f32 %v1687_v24, %v1693_v29 }
0x1446   :  { %v1713_v20 = vpop.permute.xlu1 %1712 }
0x1447   :  { %3652 = vpow2.f32 %v1696_v31  ;;  %v1698_v34 = vmul.f32 1.442695, %v1695_v32  ;;  %v1718_v35 = vsel %vm308_vm3, %v1713_v20, 0 }
0x1448   :  { %3437 = vmatpush3.bf16.msra.mxu1 %v1718_v35 }
0x1449   :  { %3654 = vpow2.f32 %v1698_v34  ;;  %3448 = vmatprep.subr.bf16.mxu1 %v3797_v0 }
0x1451   :  { %v3653_v36 = vpop.eup %3652 }
0x1452   :  { %v1700_v37 = vsel %vm167_vm2, %v3653_v36, 0.0 }
0x1453   :  { %v3655_v3 = vpop.eup %3654  ;;  %1701 = vadd.xlane.f32.xlu1 %v1700_v37 }
0x1454   :  { %v1703_v4 = vsel %vm167_vm2, %v3655_v3, 0.0 }
0x1455   :  { %1704 = vadd.xlane.f32.xlu0 %v1703_v4 }
0x1464   :  { %1811 = vrot.lane.b32.xlu1 %v4257_v58, %s3801_s29 }
0x1468   :  { %1861 = vrot.lane.b32.xlu1 %v4259_v59, %s3801_s29  ;;  %s3811_s29 = smov [#allocation8]  }
0x146b   :  { %1760 = vrot.lane.b32.xlu0 %v4259_v59, %s3800_s22 }
0x146c   :  { %1859 = vrot.lane.b32.xlu1 %v4259_v59, %s3802_s30 }
0x146f   :  { %1809 = vrot.lane.b32.xlu0 %v4257_v58, %s3802_s30  ;;  %s3060_s30 = sshll.u32 %s3811_s29, 4  ;;  %s3061_s30 = int_to_ptr.vmem [resolvable:$true] %s3060_s30 }
0x1470   :  { %p3769_p11 = scmp.lt.s32.totalorder %s3061_s30, %s3061_s30 }
0x14e0   :  { %v1702_v38 = vpop.xlane.xlu1 %1701 }
0x14e1   :  { %3656 = vrcp.f32 %v1702_v38 }
0x14e2   :  { %v1705_v39 = vpop.xlane.xlu0 %1704 }
0x14e3   :  { %3658 = vrcp.f32 %v1705_v39 }
0x14e4   :  { %v1812_v43 = vpop.permute.xlu1 %1811 }
0x14e5   :  { %v1817_v27 = vsel %vm167_vm2, %v1812_v43, 0 }
0x14e6   :  { %v1761_v40 = vpop.permute.xlu0 %1760 }
0x14e7   :  { %v1766_v41 = vsel %vm308_vm3, %v1761_v40, 0 }
0x14e8   :  { %3443 = vmatpush3.bf16.msra.mxu0 %v1766_v41  ;;  %v1862_v50 = vpop.permute.xlu1 %1861 }
0x14e9   :  { %3454 = vmatprep.subr.bf16.mxu0 %v3797_v0  ;;  %v1867_v53 = vsel %vm167_vm2, %v1862_v50, 0 }
0x14ea   :  { %v1810_v54 = vpop.permute.xlu0 %1809 }
0x14eb   :  { %v3657_v30 = vpop.eup %3656 }
0x14ec   :  { %v1708_v45 = vmul.f32 %v3657_v30, %v3653_v36  ;;  %v1860_v55 = vpop.permute.xlu1 %1859 }
0x14ed   :  { %v3659_v46 = vpop.eup %3658 }
0x14ee   :  { %v1709_v48 = vmul.f32 %v3659_v46, %v3655_v3  ;;  %v1710_v49 = vpack.c.bf16 %v1708_v45, %v1708_v45  ;;  %v3107_v45 = vld [vmem:[%s4561_s5 + $0x14] sm:$0xf] }
0x14f0   :  { %3439 = vmatmul.mubr.msk.bf16.vlgmr.msra.gmra.mrb[52].mxu1 %vm167_vm2, %v1710_v49  ;;  %v1711_v52 = vpack.c.bf16 %v1709_v48, %v1709_v48  ;;  %v2038_v49 = vsel %vm308_vm3, %v3107_v45, 0 }
0x14f1   :  { %3449 = vmatpush3.bf16.xpose.msra.mxu1 %v1817_v27  ;;  %3450 = vmatprep.mubr.msk.bf16.mxu1 %vm3798_vm0, %v3797_v0  ;;  %v3106_v27 = vld [vmem:[%s4561_s5 + $0x10] sm:$0xf] }
0x14f2   :  { %3445 = vmatmul.mubr.msk.bf16.vlgmr.msra.gmra.mrb[52].mxu0 %vm167_vm2, %v1711_v52  ;;  %3460 = vmatprep.subr.bf16.mxu1 %v3797_v0 }
0x14f3   :  { %3455 = vmatpush3.bf16.xpose.msra.mxu0 %v1867_v53  ;;  %3456 = vmatprep.mubr.msk.bf16.mxu0 %vm3798_vm0, %v3797_v0 }
0x14f4   :  { %3466 = vmatprep.subr.bf16.mxu0 %v3797_v0 }
0x14f8   :  { %3451 = vmatmul.mubr.msk.bf16.vlgmr.msra.gmra.mrb[56].mxu1 %vm167_vm2, %v1810_v54  ;;  %v2085_v54 = vsel %vm308_vm3, %v3106_v27, 0 }
0x14f9   :  { %3462 = vmatprep.mubr.msk.bf16.mxu1 %vm3798_vm0, %v3797_v0 }
0x14fa   :  { %3457 = vmatmul.mubr.msk.bf16.vlgmr.msra.gmra.mrb[56].mxu0 %vm167_vm2, %v1860_v55 }
0x14fb   :  { %3468 = vmatprep.mubr.msk.bf16.mxu0 %vm3798_vm0, %v3797_v0 }
0x15c3   :  { %v4319_v56 = vpop.f32.mrb[52].mxu1 }
0x15c4   :  { %v3440_v57 = vpop.f32.mrb[53].mxu1 }
0x15c5   :  { %v1757_v10 = vpop.f32.mrb[54].mxu1  ;;  %v4321_v14 = vpop.f32.mrb[52].mxu0 }
0x15c6   :  { %v1808_v60 = vpack.c.bf16 %v4321_v14, %v4319_v56  ;;  %v3441_v61 = vpop.f32.mrb[55].mxu1  ;;  %v3446_v62 = vpop.f32.mrb[53].mxu0 }
0x15c7   :  { %v1805_v63 = vpop.f32.mrb[54].mxu0 }
0x15c8   :  { %v3447_v1 = vpop.f32.mrb[55].mxu0 }
0x15cb   :  { %v1853_v2 = vpop.f32.mrb[56].mxu1 }
0x15cc   :  { %v1909_v5 = vmul.f32 0.35355338, %v1853_v2  ;;  %v3452_v7 = vpop.f32.mrb[57].mxu1 }
0x15cd   :  { %v1856_v12 = vpop.f32.mrb[58].mxu1  ;;  %v1903_v13 = vpop.f32.mrb[56].mxu0 }
0x15ce   :  { %v1910_v15 = vmul.f32 0.35355338, %v1903_v13  ;;  %v3453_v16 = vpop.f32.mrb[59].mxu1  ;;  %v3458_v18 = vpop.f32.mrb[57].mxu0  ;;  %v1911_v19 = vadd.f32 %v4277_v17, %v1909_v5 }
0x15cf   :  { %v1906_v21 = vpop.f32.mrb[58].mxu0 }
0x15d0   :  { %v3459_v22 = vpop.f32.mrb[59].mxu0  ;;  %v1913_v24 = vsel %vm167_vm2, %v1911_v19, -inf  ;;  %v1912_v25 = vadd.f32 %v4281_v23, %v1910_v15 }
0x15d1   :  { %1914 = vmax.xlane.f32.xlu0 %v1913_v24 }
0x15d2   :  { %v1916_v26 = vsel %vm167_vm2, %v1912_v25, -inf }
0x15d3   :  { %1917 = vmax.xlane.f32.xlu1 %v1916_v26 }
0x15e4   :  { %1937 = vrot.lane.b32.xlu1 %v4257_v58, %s3803_s13 }
0x15e8   :  { %2130 = vrot.lane.b32.xlu1 %v4257_v58, %s3805_s17 }
0x15ec   :  { %2180 = vrot.lane.b32.xlu1 %v4259_v59, %s3805_s17 }
0x15f0   :  { %2178 = vrot.lane.b32.xlu1 %v4259_v59, %s3804_s14 }
0x165e   :  { %v1915_v28 = vpop.xlane.xlu0 %1914 }
0x165f   :  { %v1919_v29 = vsub.f32 %v1911_v19, %v1915_v28 }
0x1660   :  { %v1918_v31 = vpop.xlane.xlu1 %1917 }
0x1661   :  { %v1921_v32 = vmul.f32 1.442695, %v1919_v29  ;;  %v1920_v20 = vsub.f32 %v1912_v25, %v1918_v31 }
0x1663   :  { %3660 = vpow2.f32 %v1921_v32  ;;  %v1923_v34 = vmul.f32 1.442695, %v1920_v20 }
0x1664   :  { %v1938_v35 = vpop.permute.xlu1 %1937 }
0x1665   :  { %3662 = vpow2.f32 %v1923_v34  ;;  %v1943_v36 = vsel %vm308_vm3, %v1938_v35, 0 }
0x1666   :  { %3461 = vmatpush3.bf16.msra.mxu1 %v1943_v36 }
0x1667   :  { %3472 = vmatprep.subr.bf16.mxu1 %v3797_v0 }
0x1668   :  { %v2131_v55 = vpop.permute.xlu1 %2130 }
0x1669   :  { %v2136_v7 = vsel %vm167_vm2, %v2131_v55, 0 }
0x166c   :  { %v2181_v57 = vpop.permute.xlu1 %2180 }
0x166d   :  { %v3661_v37 = vpop.eup %3660  ;;  %v2186_v10 = vsel %vm167_vm2, %v2181_v57, 0 }
0x166e   :  { %v1925_v3 = vsel %vm167_vm2, %v3661_v37, 0.0 }
0x166f   :  { %v3663_v4 = vpop.eup %3662  ;;  %1926 = vadd.xlane.f32.xlu0 %v1925_v3 }
0x1670   :  { %v1928_v38 = vsel %vm167_vm2, %v3663_v4, 0.0  ;;  %v2179_v61 = vpop.permute.xlu1 %2178 }
0x1673   :  { %1929 = vadd.xlane.f32.xlu0 %v1928_v38 }
0x1689   :  { %1985 = vrot.lane.b32.xlu0 %v4259_v59, %s3803_s13  ;;  %s3764_s13 = scalar_lea.vmem %s3061_s30, 32 }
0x168a   :  { %p3765_p10 = scmp.ne.s32.totalorder %s3061_s30, %s3764_s13  ;;  %p3770_p12 = scmp.lt.s32.totalorder %s3764_s13, %s3764_s13 }
0x168c   :  { %p3771_p13 = por %p3770_p12, %p3769_p11 }
0x168d   :  { %2128 = vrot.lane.b32.xlu0 %v4257_v58, %s3804_s14 }
0x168e   :  { %p3772_p0 = pnand %p3771_p13, %p3765_p10 }
0x16fc   :  { %v1927_v39 = vpop.xlane.xlu0 %1926 }
0x16fd   :  { %3664 = vrcp.f32 %v1927_v39 }
0x1700   :  { %v1930_v40 = vpop.xlane.xlu0 %1929 }
0x1701   :  { %3666 = vrcp.f32 %v1930_v40 }
0x1704   :  { %v1986_v41 = vpop.permute.xlu0 %1985 }
0x1705   :  { %v1991_v43 = vsel %vm308_vm3, %v1986_v41, 0 }
0x1706   :  { %3467 = vmatpush3.bf16.msra.mxu0 %v1991_v43 }
0x1707   :  { %v3665_v30 = vpop.eup %3664  ;;  %3478 = vmatprep.subr.bf16.mxu0 %v3797_v0 }
0x1708   :  { %v1933_v46 = vmul.f32 %v3665_v30, %v3661_v37  ;;  %v2129_v16 = vpop.permute.xlu0 %2128 }
0x170a   :  { %v1935_v48 = vpack.c.bf16 %v1933_v46, %v1933_v46 }
0x170b   :  { %v3667_v50 = vpop.eup %3666 }
0x170c   :  { %v1934_v52 = vmul.f32 %v3667_v50, %v3663_v4  ;;  %3463 = vmatmul.mubr.msk.bf16.vlgmr.msra.gmra.mrb[60].mxu1 %vm167_vm2, %v1935_v48 }
0x170d   :  { %3473 = vmatpush3.bf16.msra.mxu1 %v2038_v49  ;;  %3474 = vmatprep.mubr.msk.bf16.mxu1 %vm3798_vm0, %v3797_v0 }
0x170e   :  { %v1936_v53 = vpack.c.bf16 %v1934_v52, %v1934_v52  ;;  %3484 = vmatprep.subr.bf16.mxu1 %v3797_v0 }
0x1710   :  { %3469 = vmatmul.mubr.msk.bf16.vlgmr.msra.gmra.mrb[60].mxu0 %vm167_vm2, %v1936_v53 }
0x1711   :  { %3479 = vmatpush3.bf16.msra.mxu0 %v2085_v54  ;;  %3480 = vmatprep.mubr.msk.bf16.mxu0 %vm3798_vm0, %v3797_v0 }
0x1712   :  { %3490 = vmatprep.subr.bf16.mxu0 %v3797_v0 }
0x1718   :  { %3481 = vmatmul.mubr.msk.bf16.vlgmr.msra.gmra.mrb[64].mxu0 %vm167_vm2, %v1808_v60 }
0x1719   :  { %3492 = vmatprep.mubr.msk.bf16.mxu0 %vm3798_vm0, %v3797_v0 }
0x171a   :  { %3491 = vmatpush3.bf16.xpose.msra.mxu0 %v2186_v10 }
0x171b   :  { %3502 = vmatprep.subr.bf16.mxu0 %v3797_v0 }
0x1721   :  { %3493 = vmatmul.mubr.msk.bf16.vlgmr.msra.gmra.mrb[68].mxu0 %vm167_vm2, %v2179_v61 }
0x1722   :  { %3504 = vmatprep.mubr.msk.bf16.mxu0 %vm3798_vm0, %v3797_v0 }
0x17df   :  { %v1979_v62 = vpop.f32.mrb[60].mxu1 }
0x17e0   :  { %v3464_v63 = vpop.f32.mrb[61].mxu1 }
0x17e1   :  { %v1982_v1 = vpop.f32.mrb[62].mxu1 }
0x17e2   :  { %v3465_v56 = vpop.f32.mrb[63].mxu1 }
0x17e3   :  { %v2027_v14 = vpop.f32.mrb[60].mxu0 }
0x17e4   :  { %v2033_v60 = vpack.c.bf16 %v2027_v14, %v1979_v62  ;;  %v3470_v2 = vpop.f32.mrb[61].mxu0 }
0x17e5   :  { %v2030_v5 = vpop.f32.mrb[62].mxu0 }
0x17e6   :  { %v3471_v12 = vpop.f32.mrb[63].mxu0  ;;  %3475 = vmatmul.mubr.msk.bf16.vlgmr.msra.gmra.mrb[64].mxu1 %vm167_vm2, %v2033_v60 }
0x17e7   :  { %3485 = vmatpush3.bf16.xpose.msra.mxu1 %v2136_v7  ;;  %3486 = vmatprep.mubr.msk.bf16.mxu1 %vm3798_vm0, %v3797_v0 }
0x17e8   :  { %3496 = vmatprep.subr.bf16.mxu1 %v3797_v0 }
0x17eb   :  { %v2121_v13 = vpop.f32.mrb[64].mxu0 }
0x17ec   :  { %v3482_v15 = vpop.f32.mrb[65].mxu0 }
0x17ed   :  { %v2124_v18 = vpop.f32.mrb[66].mxu0 }
0x17ee   :  { %v3483_v19 = vpop.f32.mrb[67].mxu0  ;;  %3487 = vmatmul.mubr.msk.bf16.vlgmr.msra.gmra.mrb[68].mxu1 %vm167_vm2, %v2129_v16 }
0x17ef   :  { %3498 = vmatprep.mubr.msk.bf16.mxu1 %vm3798_vm0, %v3797_v0 }
0x17f4   :  { %v2222_v21 = vpop.f32.mrb[68].mxu0 }
0x17f5   :  { %v2229_v22 = vmul.f32 0.35355338, %v2222_v21  ;;  %v3494_v24 = vpop.f32.mrb[69].mxu0 }
0x17f6   :  { %v2225_v25 = vpop.f32.mrb[70].mxu0 }
0x17f7   :  { %v3495_v26 = vpop.f32.mrb[71].mxu0  ;;  %v2231_v28 = vadd.f32 %v4281_v23, %v2229_v22 }
0x17f9   :  { %v2235_v29 = vsel %vm167_vm2, %v2231_v28, -inf }
0x17fa   :  { %2236 = vmax.xlane.f32.xlu1 %v2235_v29 }
0x180b   :  { %2256 = vrot.lane.b32.xlu1 %v4257_v58, %s3806_s23 }
0x180f   :  { %2404 = vrot.lane.b32.xlu1 %v4257_v58, %s3807_s1 }
0x1813   :  { %2454 = vrot.lane.b32.xlu1 %v4259_v59, %s3807_s1 }
0x1817   :  { %2452 = vrot.lane.b32.xlu1 %v4259_v59, %s3808_s24 }
0x1887   :  { %v2237_v31 = vpop.xlane.xlu1 %2236 }
0x1888   :  { %v2239_v34 = vsub.f32 %v2231_v28, %v2237_v31 }
0x188a   :  { %v2242_v35 = vmul.f32 1.442695, %v2239_v34 }
0x188b   :  { %v2257_v32 = vpop.permute.xlu1 %2256 }
0x188c   :  { %v2262_v20 = vsel %vm308_vm3, %v2257_v32, 0  ;;  %3668 = vpow2.f32 %v2242_v35 }
0x188d   :  { %3497 = vmatpush3.bf16.msra.mxu1 %v2262_v20 }
0x188e   :  { %3508 = vmatprep.subr.bf16.mxu1 %v3797_v0 }
0x188f   :  { %v2405_v60 = vpop.permute.xlu1 %2404 }
0x1890   :  { %v2410_v5 = vsel %vm167_vm2, %v2405_v60, 0 }
0x1893   :  { %v2455_v22 = vpop.permute.xlu1 %2454 }
0x1894   :  { %v2460_v29 = vsel %vm167_vm2, %v2455_v22, 0 }
0x1896   :  { %v3669_v49 = vpop.eup %3668 }
0x1897   :  { %v2247_v50 = vsel %vm167_vm2, %v3669_v49, 0.0 }
0x18b9   :  { %v2074_v36 = vpop.f32.mrb[64].mxu1 }
0x18ba   :  { %v4394_v37 = vadd.f32 %v2121_v13, %v2074_v36  ;;  %v3476_v3 = vpop.f32.mrb[65].mxu1  ;;  %v3108_v13 = vld [vmem:[%s4561_s5 + $0x18] sm:$0xf] }
0x18bb   :  { %v2077_v4 = vpop.f32.mrb[66].mxu1  ;;  %v2357_v15 = vsel %vm308_vm3, %v3108_v13, 0 }
0x18bc   :  { %v4396_v38 = vadd.f32 %v2124_v18, %v2077_v4  ;;  %v3477_v39 = vpop.f32.mrb[67].mxu1  ;;  %v2453_v4 = vpop.permute.xlu1 %2452 }
0x18c1   :  { %v2172_v40 = vpop.f32.mrb[68].mxu1 }
0x18c2   :  { %v2228_v41 = vmul.f32 0.35355338, %v2172_v40  ;;  %v3488_v43 = vpop.f32.mrb[69].mxu1 }
0x18c3   :  { %v2175_v30 = vpop.f32.mrb[70].mxu1 }
0x18c4   :  { %v3489_v45 = vpop.f32.mrb[71].mxu1  ;;  %v2230_v46 = vadd.f32 %v4277_v17, %v2228_v41 }
0x18c6   :  { %v2232_v48 = vsel %vm167_vm2, %v2230_v46, -inf }
0x18c7   :  { %2233 = vmax.xlane.f32.xlu0 %v2232_v48 }
0x18cb   :  { %2248 = vadd.xlane.f32.xlu0 %v2247_v50 }
0x1954   :  { %v2234_v27 = vpop.xlane.xlu0 %2233 }
0x1955   :  { %v2238_v52 = vsub.f32 %v2230_v46, %v2234_v27 }
0x1957   :  { %v2240_v53 = vmul.f32 1.442695, %v2238_v52 }
0x1958   :  { %v2249_v57 = vpop.xlane.xlu0 %2248 }
0x1959   :  { %3670 = vpow2.f32 %v2240_v53 }
0x195a   :  { %3672 = vrcp.f32 %v2249_v57 }
0x1963   :  { %v3671_v54 = vpop.eup %3670 }
0x1964   :  { %v2244_v55 = vsel %vm167_vm2, %v3671_v54, 0.0  ;;  %v3673_v10 = vpop.eup %3672 }
0x1965   :  { %2245 = vadd.xlane.f32.xlu0 %v2244_v55  ;;  %v2253_v62 = vmul.f32 %v3673_v10, %v3669_v49 }
0x1967   :  { %v2255_v56 = vpack.c.bf16 %v2253_v62, %v2253_v62 }
0x197b   :  { %2304 = vrot.lane.b32.xlu0 %v4259_v59, %s3806_s23 }
0x197f   :  { %2402 = vrot.lane.b32.xlu0 %v4257_v58, %s3808_s24 }
0x19f2   :  { %v2246_v61 = vpop.xlane.xlu0 %2245 }
0x19f3   :  { %3674 = vrcp.f32 %v2246_v61 }
0x19f6   :  { %v2305_v63 = vpop.permute.xlu0 %2304 }
0x19f7   :  { %v2310_v1 = vsel %vm308_vm3, %v2305_v63, 0 }
0x19f8   :  { %3503 = vmatpush3.bf16.msra.mxu0 %v2310_v1 }
0x19f9   :  { %3514 = vmatprep.subr.bf16.mxu0 %v3797_v0 }
0x19fa   :  { %v2403_v12 = vpop.permute.xlu0 %2402 }
0x19fb   :  { %3505 = vmatmul.mubr.msk.bf16.vlgmr.msra.gmra.mrb[72].mxu0 %vm167_vm2, %v2255_v56 }
0x19fc   :  { %3516 = vmatprep.mubr.msk.bf16.mxu0 %vm3798_vm0, %v3797_v0 }
0x19fd   :  { %v3675_v14 = vpop.eup %3674 }
0x19fe   :  { %v2252_v2 = vmul.f32 %v3675_v14, %v3671_v54 }
0x1a00   :  { %v2254_v7 = vpack.c.bf16 %v2252_v2, %v2252_v2 }
0x1a01   :  { %3515 = vmatpush3.bf16.xpose.msra.mxu0 %v2410_v5  ;;  %v3109_v5 = vld [vmem:[%s4561_s5 + $0x1c] sm:$0xf] }
0x1a02   :  { %3499 = vmatmul.mubr.msk.bf16.vlgmr.msra.gmra.mrb[72].mxu1 %vm167_vm2, %v2254_v7  ;;  %3526 = vmatprep.subr.bf16.mxu0 %v3797_v0  ;;  %v2631_v7 = vsel %vm308_vm3, %v3109_v5, 0 }
0x1a03   :  { %3510 = vmatprep.mubr.msk.bf16.mxu1 %vm3798_vm0, %v3797_v0  ;;  %3509 = vmatpush3.bf16.msra.mxu1 %v2357_v15 }
0x1a04   :  { %3520 = vmatprep.subr.bf16.mxu1 %v3797_v0 }
0x1a08   :  { %3517 = vmatmul.mubr.msk.bf16.vlgmr.msra.gmra.mrb[76].mxu0 %vm167_vm2, %v2403_v12 }
0x1a09   :  { %3528 = vmatprep.mubr.msk.bf16.mxu0 %vm3798_vm0, %v3797_v0 }
0x1ace   :  { %v2346_v16 = vpop.f32.mrb[72].mxu0 }
0x1acf   :  { %v3506_v18 = vpop.f32.mrb[73].mxu0 }
0x1ad0   :  { %v2349_v19 = vpop.f32.mrb[74].mxu0 }
0x1ad1   :  { %v3507_v21 = vpop.f32.mrb[75].mxu0 }
0x1ad5   :  { %v2298_v24 = vpop.f32.mrb[72].mxu1 }
0x1ad6   :  { %v2352_v25 = vpack.c.bf16 %v2346_v16, %v2298_v24  ;;  %v3500_v26 = vpop.f32.mrb[73].mxu1 }
0x1ad7   :  { %v2301_v28 = vpop.f32.mrb[74].mxu1 }
0x1ad8   :  { %v3501_v31 = vpop.f32.mrb[75].mxu1  ;;  %3511 = vmatmul.mubr.msk.bf16.vlgmr.msra.gmra.mrb[76].mxu1 %vm167_vm2, %v2352_v25 }
0x1ad9   :  { %3521 = vmatpush3.bf16.xpose.msra.mxu1 %v2460_v29  ;;  %3522 = vmatprep.mubr.msk.bf16.mxu1 %vm3798_vm0, %v3797_v0 }
0x1ada   :  { %3532 = vmatprep.subr.bf16.mxu1 %v3797_v0 }
0x1adb   :  { %v2446_v32 = vpop.f32.mrb[76].mxu0 }
0x1adc   :  { %v2502_v20 = vmul.f32 0.35355338, %v2446_v32  ;;  %v3518_v34 = vpop.f32.mrb[77].mxu0  ;;  %v4467_v32 = vld [vmem:[%s4565_s9 + $0x8] sm:$0x3f] }
0x1add   :  { %v2449_v35 = vpop.f32.mrb[78].mxu0  ;;  %v2719_v5 = vrot.slane %v4467_v32, %v1311_v47  ;;  %v3609_v47 = vld [vmem:[%s4564_s8 + $0x38] sm:$0xff]  }
0x1ade   :  { %v3519_v36 = vpop.f32.mrb[79].mxu0  ;;  %v2504_v3 = vadd.f32 %v4277_v17, %v2502_v20  ;;  %v2679_v20 = vrot.slane %v4467_v32, %v1270_v9 }
0x1ae0   :  { %3523 = vmatmul.mubr.msk.bf16.vlgmr.msra.gmra.mrb[80].mxu1 %vm167_vm2, %v2453_v4  ;;  %v2506_v39 = vsel %vm167_vm2, %v2504_v3, -inf }
0x1ae1   :  { %2507 = vmax.xlane.f32.xlu0 %v2506_v39  ;;  %3534 = vmatprep.mubr.msk.bf16.mxu1 %vm3798_vm0, %v3797_v0 }
0x1b6e   :  { %v2508_v40 = vpop.xlane.xlu0 %2507 }
0x1b6f   :  { %v2512_v41 = vsub.f32 %v2504_v3, %v2508_v40 }
0x1b71   :  { %v2514_v43 = vmul.f32 1.442695, %v2512_v41 }
0x1b73   :  { %3676 = vpow2.f32 %v2514_v43 }
0x1b7d   :  { %v3677_v30 = vpop.eup %3676 }
0x1b7e   :  { %v2518_v45 = vsel %vm167_vm2, %v3677_v30, 0.0 }
0x1b7f   :  { %2519 = vadd.xlane.f32.xlu0 %v2518_v45 }
0x1bab   :  { %v2393_v46 = vpop.f32.mrb[76].mxu1 }
0x1bac   :  { %v2400_v17 = vadd.f32 %v2393_v46, %v4394_v37  ;;  %v3512_v48 = vpop.f32.mrb[77].mxu1 }
0x1bad   :  { %v2396_v49 = vpop.f32.mrb[78].mxu1 }
0x1bae   :  { %v4437_v50 = vadd.f32 %v2396_v49, %v4396_v38  ;;  %v3513_v27 = vpop.f32.mrb[79].mxu1 }
0x1bb3   :  { %v2496_v52 = vpop.f32.mrb[80].mxu1 }
0x1bb4   :  { %v2503_v53 = vmul.f32 0.35355338, %v2496_v52  ;;  %v3524_v54 = vpop.f32.mrb[81].mxu1 }
0x1bb5   :  { %v2499_v55 = vpop.f32.mrb[82].mxu1 }
0x1bb6   :  { %v3525_v57 = vpop.f32.mrb[83].mxu1  ;;  %v2505_v10 = vadd.f32 %v4281_v23, %v2503_v53  ;;  %v3605_v55 = vld [vmem:[%s4562_s6 + $0x18] sm:$0xff]  }
0x1bb7   :  { %v3606_v57 = vld [vmem:[%s4564_s8 + $0x20] sm:$0xff]  }
0x1bb8   :  { %v2509_v61 = vsel %vm167_vm2, %v2505_v10, -inf }
0x1bb9   :  { %2510 = vmax.xlane.f32.xlu1 %v2509_v61 }
0x1bca   :  { %2530 = vrot.lane.b32.xlu1 %v4257_v58, %s3809_s7 }
0x1c0c   :  { %v2520_v37 = vpop.xlane.xlu0 %2519 }
0x1c0d   :  { %3678 = vrcp.f32 %v2520_v37 }
0x1c17   :  { %v3679_v62 = vpop.eup %3678 }
0x1c18   :  { %v2526_v1 = vmul.f32 %v3679_v62, %v3677_v30 }
0x1c1a   :  { %v2528_v2 = vpack.c.bf16 %v2526_v1, %v2526_v1 }
0x1c46   :  { %v2511_v63 = vpop.xlane.xlu1 %2510 }
0x1c47   :  { %v2513_v38 = vsub.f32 %v2505_v10, %v2511_v63  ;;  %v3607_v10 = vld [vmem:[%s4564_s8 + $0x28] sm:$0xff]  }
0x1c49   :  { %v2516_v56 = vmul.f32 1.442695, %v2513_v38 }
0x1c4a   :  { %v2531_v14 = vpop.permute.xlu1 %2530 }
0x1c4b   :  { %3680 = vpow2.f32 %v2516_v56  ;;  %v2536_v60 = vsel %vm308_vm3, %v2531_v14, 0  ;;  %v2713_v56 = vrot.slane %v4467_v32, %v1305_v33  ;;  %v3608_v33 = vld [vmem:[%s4564_s8 + $0x30] sm:$0xff]  }
0x1c4c   :  { %3527 = vmatpush3.bf16.msra.mxu0 %v2536_v60 }
0x1c4d   :  { %3538 = vmatprep.subr.bf16.mxu0 %v3797_v0 }
0x1c4f   :  { %3529 = vmatmul.mubr.msk.bf16.vlgmr.msra.gmra.mrb[80].mxu0 %vm167_vm2, %v2528_v2 }
0x1c50   :  { %3540 = vmatprep.mubr.msk.bf16.mxu0 %vm3798_vm0, %v3797_v0  ;;  %3539 = vmatpush3.bf16.msra.mxu0 %v2631_v7 }
0x1c51   :  { %3552 = vmatprep.subr.bf16.mxu0 %v3797_v0 }
0x1c55   :  { %v3681_v58 = vpop.eup %3680 }
0x1c56   :  { %v2521_v23 = vsel %vm167_vm2, %v3681_v58, 0.0 }
0x1c57   :  { %2522 = vadd.xlane.f32.xlu0 %v2521_v23 }
0x1c6d   :  { %2578 = vrot.lane.b32.xlu0 %v4259_v59, %s3809_s7 }
0x1ce4   :  { %v2523_v12 = vpop.xlane.xlu0 %2522 }
0x1ce5   :  { %3682 = vrcp.f32 %v2523_v12 }
0x1ce8   :  { %v2579_v13 = vpop.permute.xlu0 %2578 }
0x1ce9   :  { %v2584_v15 = vsel %vm308_vm3, %v2579_v13, 0 }
0x1cea   :  { %3533 = vmatpush3.bf16.msra.mxu1 %v2584_v15 }
0x1ceb   :  { %3544 = vmatprep.subr.bf16.mxu1 %v3797_v0 }
0x1cef   :  { %v3683_v16 = vpop.eup %3682 }
0x1cf0   :  { %v2527_v18 = vmul.f32 %v3683_v16, %v3681_v58  ;;  %v3142_v16 = vld [vmem:[#allocation7 + $0x1] ss:$0 sm:$0xff] }
0x1cf2   :  { %v2529_v59 = vpack.c.bf16 %v2527_v18, %v2527_v18 }
0x1cf4   :  { %3535 = vmatmul.mubr.msk.bf16.vlgmr.msra.gmra.mrb[84].mxu1 %vm167_vm2, %v2529_v59 }
0x1cf5   :  { %3548 = vmatprep.mubr.msk.bf16.mxu1 %vm3798_vm0, %v3797_v0 }
0x1d22   :  { %v2572_v19 = vpop.f32.mrb[80].mxu0 }
0x1d23   :  { %v3530_v21 = vpop.f32.mrb[81].mxu0 }
0x1d24   :  { %v2575_v22 = vpop.f32.mrb[82].mxu0 }
0x1d25   :  { %v3531_v24 = vpop.f32.mrb[83].mxu0 }
0x1dc7   :  { %v2620_v25 = vpop.f32.mrb[84].mxu1 }
0x1dc8   :  { %v2626_v26 = vpack.c.bf16 %v2620_v25, %v2572_v19  ;;  %v3536_v28 = vpop.f32.mrb[85].mxu1 }
0x1dc9   :  { %v2623_v29 = vpop.f32.mrb[86].mxu1 }
0x1dca   :  { %v3537_v31 = vpop.f32.mrb[87].mxu1  ;;  %3541 = vmatmul.mubr.msk.bf16.vlgmr.msra.gmra.mrb[84].mxu0 %vm167_vm2, %v2626_v26  ;;  %v2807_v29 = vrot.slane %v4467_v32, %v1396_v6  ;;  %v2916_v6 = vld [vmem:[%s4558_s2] sm:$0xff] }
0x1dcb   :  { %3560 = vmatprep.mubr.msk.bf16.mxu0 %vm3798_vm0, %v3797_v0  ;;  %3553 = vmatpush3.bf16.msra.mxu0 %v3606_v57 }
0x1dcc   :  { %3554 = vmatprep.subr.bf16.mxu0 %v3797_v0 }
0x1dcf   :  { %3555 = vmatpush3.bf16.msra.mxu0 %v3607_v10 }
0x1dd0   :  { %3556 = vmatprep.subr.bf16.mxu0 %v3797_v0 }
0x1dd3   :  { %3557 = vmatpush3.bf16.msra.mxu0 %v3608_v33 }
0x1dd4   :  { %3558 = vmatprep.subr.bf16.mxu0 %v3797_v0 }
0x1dd7   :  { %3559 = vmatpush3.bf16.msra.mxu0 %v3609_v47 }
0x1e9d   :  { %v2667_v34 = vpop.f32.mrb[84].mxu0 }
0x1e9e   :  { %v2674_v35 = vadd.f32 %v2667_v34, %v2400_v17  ;;  %v3542_v36 = vpop.f32.mrb[85].mxu0 }
0x1e9f   :  { %v2670_v3 = vpop.f32.mrb[86].mxu0 }
0x1ea0   :  { %v2680_v4 = vadd.f32 %v2679_v20, %v2674_v35  ;;  %v2675_v39 = vadd.f32 %v2670_v3, %v4437_v50  ;;  %v3543_v40 = vpop.f32.mrb[87].mxu0 }
0x1ea2   :  { %v2681_v41 = vadd.f32 %v2679_v20, %v2675_v39  ;;  %v2682_v43 = vadd.f32 %v2680_v4, %v4248_v11 }
0x1ea4   :  { %v2684_v30 = vsel %vm117_vm1, %v2682_v43, 0.0  ;;  %v2683_v45 = vadd.f32 %v2681_v41, %v4250_v51  ;;  %v3604_v51 = vld [vmem:[%s4562_s6 + $0x10] sm:$0xff]  }
0x1ea5   :  { %2685 = vadd.xlane.f32.xlu1 %v2684_v30  ;;  %3545 = vmatpush3.bf16.msra.mxu1 %v3604_v51  ;;  %v2945_v30 = vsel %vm2944_vm5, %v2916_v6, 0.0 }
0x1ea6   :  { %v2687_v46 = vsel %vm117_vm1, %v2683_v45, 0.0  ;;  %3546 = vmatprep.subr.bf16.mxu1 %v3797_v0 }
0x1ea7   :  { %2688 = vadd.xlane.f32.xlu0 %v2687_v46  ;;  %v2946_v46 = vrot.slane %v2945_v30, 4 }
0x1ea9   :  { %3547 = vmatpush3.bf16.msra.mxu1 %v3605_v55 }
0x1eaa   :  { %3564 = vmatprep.subr.bf16.mxu1 %v3797_v0 }
0x1f32   :  { %v2686_v9 = vpop.xlane.xlu1 %2685 }
0x1f33   :  { %v2690_v48 = vmul.f32 0.03125, %v2686_v9 }
0x1f34   :  { %v2689_v17 = vpop.xlane.xlu0 %2688 }
0x1f35   :  { %v2692_v49 = vsub.f32 %v2682_v43, %v2690_v48  ;;  %v2691_v27 = vmul.f32 0.03125, %v2689_v17  ;;  %v3810_v43 = vmov 0   ;;  %v2947_v48 = vadd.f32 %v2946_v46, %v2945_v30 }
0x1f36   :  { %3592 = vset.pattern.permute.xlu1 %v3810_v43  ;;  %3593 = vset.pattern.permute.xlu0 %v3810_v43 }
0x1f37   :  { %v2693_v52 = vsub.f32 %v2683_v45, %v2691_v27  ;;  %v2694_v53 = vmul.f32 %v2692_v49, %v2692_v49  ;;  %v2917_v45 = vld [vmem:[%s4558_s2 + $0x8] sm:$0xff] }
0x1f38   :  { %v2952_v9 = vsel %vm2944_vm5, %v2917_v45, 0.0 }
0x1f39   :  { %v2696_v50 = vsel %vm117_vm1, %v2694_v53, 0.0  ;;  %v2695_v54 = vmul.f32 %v2693_v52, %v2693_v52  ;;  %v2953_v17 = vrot.slane %v2952_v9, 4 }
0x1f3a   :  { %2697 = vadd.xlane.f32.xlu1 %v2696_v50 }
0x1f3b   :  { %v2699_v11 = vsel %vm117_vm1, %v2695_v54, 0.0  ;;  %v2954_v27 = vadd.f32 %v2953_v17, %v2952_v9 }
0x1f3c   :  { %2700 = vadd.xlane.f32.xlu0 %v2699_v11 }
0x1f3d   :  { %v2955_v50 = vrot.slane %v2954_v27, 2 }
0x1f3f   :  { %v2956_v10 = vadd.f32 %v2955_v50, %v2954_v27 }
0x1fc7   :  { %v2698_v61 = vpop.xlane.xlu1 %2697 }
0x1fc8   :  { %v2702_v37 = vmul.f32 0.03125, %v2698_v61 }
0x1fc9   :  { %v2701_v62 = vpop.xlane.xlu0 %2700 }
0x1fca   :  { %v2704_v63 = vadd.f32 1e-05, %v2702_v37  ;;  %v2703_v38 = vmul.f32 0.03125, %v2701_v62 }
0x1fcc   :  { %3684 = vrsqrt.f32 %v2704_v63  ;;  %v2705_v1 = vadd.f32 1e-05, %v2703_v38 }
0x1fce   :  { %3686 = vrsqrt.f32 %v2705_v1  ;;  %v2957_v1 = vrot.slane %v2956_v10, 1 }
0x1fd6   :  { %v3685_v14 = vpop.eup %3684 }
0x1fd7   :  { %v2708_v60 = vmul.f32 %v3685_v14, %v2692_v49  ;;  %v2948_v49 = vrot.slane %v2947_v48, 2 }
0x1fd8   :  { %v3687_v2 = vpop.eup %3686 }
0x1fd9   :  { %v2714_v58 = vmul.f32 %v2713_v56, %v2708_v60  ;;  %v2709_v23 = vmul.f32 %v3687_v2, %v2693_v52  ;;  %v2949_v53 = vadd.f32 %v2948_v49, %v2947_v48  ;;  %v2958_v60 = vadd.f32 %v2957_v1, %v2956_v10 }
0x1fdb   :  { %v2715_v7 = vmul.f32 %v2713_v56, %v2709_v23  ;;  %v2720_v12 = vadd.f32 %v2719_v5, %v2714_v58  ;;  %v2950_v57 = vrot.slane %v2949_v53, 1  ;;  %v2960_v2 = vmax.f32 %v2958_v60, 1.0 }
0x1fdd   :  { %v2721_v13 = vadd.f32 %v2719_v5, %v2715_v7  ;;  %v2951_v38 = vadd.f32 %v2950_v57, %v2949_v53  ;;  %v3610_v5 = vld [vmem:[%s4566_s10] sm:$0xff]   ;;  %v3611_v7 = vld [vmem:[%s4566_s10 + $0x8] sm:$0xff]  }
0x1fdf   :  { %v2722_v15 = vpack.c.bf16 %v2721_v13, %v2720_v12  ;;  %v2959_v14 = vmax.f32 %v2951_v38, 1.0 }
0x1fe1   :  { %3549 = vmatmul.mubr.msk.bf16.vlgmr.msra.gmra.mrb[88].mxu1 %vm117_vm1, %v2722_v15  ;;  %3688 = vrcp.f32 %v2959_v14 }
0x1fe2   :  { %3568 = vmatprep.mubr.msk.bf16.mxu1 %vm3798_vm0, %v3797_v0  ;;  %3690 = vrcp.f32 %v2960_v2  ;;  %3565 = vmatpush3.bf16.msra.mxu1 %v3610_v5 }
0x1fe3   :  { %3566 = vmatprep.subr.bf16.mxu1 %v3797_v0  ;;  %v2913_v0 = vrot.slane %v4467_v32, %v1503_v44 }
0x1fe6   :  { %3567 = vmatpush3.bf16.msra.mxu1 %v3611_v7 }
0x1feb   :  { %v3689_v58 = vpop.eup %3688 }
0x1fec   :  { %v3691_v23 = vpop.eup %3690 }
0x20b4   :  { %v2785_v18 = vpop.f32.mrb[88].mxu1 }
0x20b5   :  { %v2786_v59 = vadd.f32 %v3142_v16, %v2785_v18  ;;  %v3550_v19 = vpop.f32.mrb[89].mxu1  ;;  %v2907_v18 = vrot.slane %v4467_v32, %v1497_v42 }
0x20b6   :  { %v2788_v21 = vpop.f32.mrb[90].mxu1 }
0x20b7   :  { %v2789_v22 = vadd.f32 %v3142_v16, %v2788_v21  ;;  %v3551_v24 = vpop.f32.mrb[91].mxu1  ;;  %v2792_v25 = vmax.f32 %v2786_v59, 0.0 }
0x20b9   :  { %v2793_v26 = vmax.f32 %v2789_v22, 0.0 }
0x20bb   :  { %v2794_v28 = vpack.c.bf16 %v2793_v26, %v2792_v25 }
0x20bd   :  { %3561 = vmatmul.mubr.msk.bf16.vlgmr.msra.gmra.mrb[88].mxu0 %vm1422_vm4, %v2794_v28 }
0x2190   :  { %v2869_v31 = vpop.f32.mrb[88].mxu0 }
0x2191   :  { %v2870_v20 = vadd.f32 %v2869_v31, %v2807_v29  ;;  %v3562_v34 = vpop.f32.mrb[89].mxu0 }
0x2192   :  { %v2872_v35 = vpop.f32.mrb[90].mxu0 }
0x2193   :  { %v2873_v36 = vadd.f32 %v2872_v35, %v2807_v29  ;;  %v3563_v3 = vpop.f32.mrb[91].mxu0  ;;  %v2876_v4 = vadd.f32 %v2870_v20, %v2720_v12 }
0x2195   :  { %v2878_v39 = vsel %vm117_vm1, %v2876_v4, 0.0  ;;  %v2877_v40 = vadd.f32 %v2873_v36, %v2721_v13 }
0x2196   :  { %2879 = vadd.xlane.f32.xlu1 %v2878_v39 }
0x2197   :  { %v2881_v41 = vsel %vm117_vm1, %v2877_v40, 0.0 }
0x2198   :  { %2882 = vadd.xlane.f32.xlu0 %v2881_v41 }
0x2223   :  { %v2880_v52 = vpop.xlane.xlu1 %2879 }
0x2224   :  { %v2884_v54 = vmul.f32 0.03125, %v2880_v52 }
0x2225   :  { %v2883_v11 = vpop.xlane.xlu0 %2882 }
0x2226   :  { %v2886_v51 = vsub.f32 %v2876_v4, %v2884_v54  ;;  %v2885_v55 = vmul.f32 0.03125, %v2883_v11 }
0x2228   :  { %v2887_v61 = vsub.f32 %v2877_v40, %v2885_v55  ;;  %v2888_v37 = vmul.f32 %v2886_v51, %v2886_v51 }
0x222a   :  { %v2890_v62 = vsel %vm117_vm1, %v2888_v37, 0.0  ;;  %v2889_v63 = vmul.f32 %v2887_v61, %v2887_v61 }
0x222b   :  { %2891 = vadd.xlane.f32.xlu1 %v2890_v62 }
0x222c   :  { %v2893_v56 = vsel %vm117_vm1, %v2889_v63, 0.0 }
0x222d   :  { %2894 = vadd.xlane.f32.xlu0 %v2893_v56 }
0x223c   :  { %2920 = vperm.xlu1 %3592, %v2916_v6  }
0x2240   :  { %2965 = vperm.xlu1 %3592, %v3689_v58  }
0x2243   :  { %2925 = vperm.xlu0 %3593, %v2917_v45  }
0x2244   :  { %2970 = vperm.xlu1 %3592, %v3691_v23  }
0x22b8   :  { %v2892_v12 = vpop.xlane.xlu1 %2891 }
0x22b9   :  { %v2896_v13 = vmul.f32 0.03125, %v2892_v12 }
0x22ba   :  { %v2895_v15 = vpop.xlane.xlu0 %2894 }
0x22bb   :  { %v2898_v33 = vadd.f32 1e-05, %v2896_v13  ;;  %v2897_v47 = vmul.f32 0.03125, %v2895_v15 }
0x22bc   :  { %v2921_v28 = vpop.permute.xlu1 %2920 }
0x22bd   :  { %3692 = vrsqrt.f32 %v2898_v33  ;;  %v2899_v16 = vadd.f32 1e-05, %v2897_v47 }
0x22bf   :  { %3694 = vrsqrt.f32 %v2899_v16 }
0x22c0   :  { %v2966_v40 = vpop.permute.xlu1 %2965 }
0x22c2   :  { %v2926_v29 = vpop.permute.xlu0 %2925 }
0x22c4   :  { %v2971_v9 = vpop.permute.xlu1 %2970 }
0x22c7   :  { %v3693_v59 = vpop.eup %3692 }
0x22c8   :  { %v2902_v19 = vmul.f32 %v3693_v59, %v2886_v51  ;;  %v3159_v51 = vld [vmem:[%s4567_s11] ss:$0 sm:$0xff] }
0x22c9   :  { %v3695_v21 = vpop.eup %3694 }
0x22ca   :  { %v2908_v22 = vmul.f32 %v2907_v18, %v2902_v19  ;;  %v2903_v24 = vmul.f32 %v3695_v21, %v2887_v61 }
0x22cc   :  { %v2914_v25 = vadd.f32 %v2913_v0, %v2908_v22  ;;  %v2909_v26 = vmul.f32 %v2907_v18, %v2903_v24 }
0x22ce   :  { %v2928_v31 = vmul.f32 %v2921_v28, %v2914_v25  ;;  %v2915_v20 = vadd.f32 %v2913_v0, %v2909_v26 }
0x22d0   :  { %v2930_v34 = vsel %vm117_vm1, %v2928_v31, 0.0  ;;  %v2929_v35 = vmul.f32 %v2926_v29, %v2915_v20 }
0x22d1   :  { %v2931_v36 = vrot.slane %v2930_v34, 4 }
0x22d2   :  { %v2937_v42 = vsel %vm117_vm1, %v2929_v35, 0.0 }
0x22d3   :  { %v2932_v3 = vadd.f32 %v2931_v36, %v2930_v34  ;;  %v2938_v4 = vrot.slane %v2937_v42, 4 }
0x22d5   :  { %v2933_v8 = vrot.slane %v2932_v3, 2  ;;  %v2939_v39 = vadd.f32 %v2938_v4, %v2937_v42 }
0x22d7   :  { %v2934_v44 = vadd.f32 %v2933_v8, %v2932_v3  ;;  %v2940_v32 = vrot.slane %v2939_v39, 2 }
0x22d9   :  { %v2935_v41 = vrot.slane %v2934_v44, 1  ;;  %v2941_v43 = vadd.f32 %v2940_v32, %v2939_v39 }
0x22db   :  { %v2936_v6 = vadd.f32 %v2935_v41, %v2934_v44  ;;  %v2942_v30 = vrot.slane %v2941_v43, 1 }
0x22dd   :  { %v2973_v45 = vmul.f32 %v2966_v40, %v2936_v6  ;;  %v2943_v46 = vadd.f32 %v2942_v30, %v2941_v43 }
0x22df   :  { %v2975_v48 = vmax.f32 %v2973_v45, 0.0  ;;  %v2974_v17 = vmul.f32 %v2971_v9, %v2943_v46 }
0x22e1   :  { %v2977_v49 = vpack.c.bf16 %v2975_v48, %v2975_v48  ;;  %v2976_v27 = vmax.f32 %v2974_v17, 0.0 }
0x22e3   :  { %v2978_v52 = vpack.c.bf16 %v2976_v27, %v2976_v27  ;;  %v2992_v53 = vunpack.c.l.b16 %v2977_v49 }
0x22e5   :  { %v2993_v50 = vunpack.c.l.b16 %v2978_v52 }
0x22e7   :  { %v2995_v54 = vsel %vm2994_vm6, %v2993_v50, %v2992_v53 }
0x22e8   :  { %v2996_v11 = vpack.c.b16 %v2995_v54, %v2995_v54 }
0x22ea   :  { %3569 = vmatmul.mubr.msk.bf16.vlgmr.msra.gmra.mrb[92].mxu1 %vm117_vm1, %v2996_v11 }
0x23bd   :  { %v3046_v55 = vpop.f32.mrb[92].mxu1 }
0x23be   :  { %v3047_v57 = vadd.f32 %v3159_v51, %v3046_v55  ;;  %v3570_v10 = vpop.f32.mrb[93].mxu1 }
0x23bf   :  { %v3049_v61 = vpop.f32.mrb[94].mxu1 }
0x23c0   :  { %v3571_v37 = vpop.f32.mrb[95].mxu1  ;;  %3053 = vst.msk [vmem:[#allocation8] sm:$0x3] %vm3052_vm7, %v3047_v57 }
0x23c1   :  { %3775 = shalt.err (!%p3772_p0)
}
0x23c2   :  { %s3776_s11 = scalar_lea.hbm %s4568_s12, 32 }
0x23c3   :  { %p3777_p1 = scmp.ne.s32.totalorder %s4568_s12, %s3776_s11  ;;  %p3780_p2 = scmp.lt.u32.totalorder %s3776_s11, %s4568_s12 }
0x23c5   :  { %p3782_p3 = pnand %p3780_p2, %p3777_p1 }
0x23c7   :  { %3785 = shalt.err (!%p3782_p3)
}
0x23c8   :  { %3063 = dma.vmem_to_hbm [thread:$0]  %s3061_s30, 32, %s4568_s12, [#allocation4]  }
0x23c9   :  { %3790 = dma.done.wait [#allocation4], 32  }
0x23ca   :  { %3791 = vsyncadd [#allocation4], 4294967264 }
0x23cb   :  { %3067 = vsyncpa [#allocation3], 1 }
0x23cc   :  { %3068 = vsyncpa [#allocation6], 1 }
0x23cd   :  { %3069 = vsyncpa [#allocation4], 1 }

</bundles_post_ra>
